<compile_context>
chip_gen: v7x
topology: tpu7x:2x2x1
jax: 0.10.0
libtpu: 0.0.40
codegen_flags: <defaults>
</compile_context>

<pallas_src>
import functools

import jax
import jax.numpy as jnp
from jax.experimental import pallas as pl
from jax.experimental.pallas import tpu as pltpu


def _block_rnn_kernel(
    x_ref,       # [R, B, L]    f32  per-round scalar inputs
    wproc_ref,   # [L, 4H, 2H]  bf16 fused hidden/cell processor (block-diagonal,
                 #                   rows ordered [h_in | c_in | h_prev | c_prev])
    bproc_ref,   # [L, 1, 2H]   f32  [b_hp | b_cp]
    whh_ref,     # [L, 2H, 4H]  bf16 LSTM hidden->gates weights (rows H:2H zero,
                 #                   g-gate cols pre-scaled by 2)
    wih_ref,     # [L, 1, 4H]   f32  LSTM input->gates weights (g cols scaled by 2)
    bg_ref,      # [L, 1, 4H]   f32  combined LSTM bias b_ih + b_hh (g cols scaled by 2)
    wout_ref,    # [H, O]       bf16 fc_out Linear weight (transposed)
    bout_ref,    # [1, O]       f32
    gamma_ref,   # [1, O]       f32  BatchNorm1d weight
    beta_ref,    # [1, O]       f32  BatchNorm1d bias
    out_ref,     # [B, O]       f32  sigmoid(BN(ReLU(Linear(final_h))))
    hfin_ref,    # [B, H]       f32  final hidden state (h_ext after last round)
    *,
    R, L, H,
):
    B = hfin_ref.shape[0]

    def round_body(r, hc):
        xr = x_ref[r]                       # [B, L] this round's scalar inputs
        hc = list(hc)
        for i in range(L):
            hc_own = hc[i]                  # own packed [h|c] from previous round
            # For i == 0, Python's hc[-1] is cell L-1's state from the previous
            # round (zeros on round 0) == h_ext / c_ext.  Serial dependency
            # (r,0) <- (r-1,L-1) is why no wavefront reordering is possible.
            hc_in = hc[i - 1]

            # Fused hidden_processor / cell_processor (one block-diagonal matmul):
            # [ph | pc] = ReLU([h_in|c_in|h_prev|c_prev] @ Wproc[i] + bproc[i]).
            lhs = jnp.concatenate([hc_in, hc_own], axis=1)            # [B, 4H]
            proc = jnp.maximum(
                jnp.dot(lhs.astype(jnp.bfloat16), wproc_ref[i],
                        preferred_element_type=jnp.float32)
                + bproc_ref[i],
                0.0,
            )                                                         # [B, 2H]
            pc = proc[:, H:2 * H]

            # LSTMCell gates: x-term computed in-kernel (broadcast FMA); the
            # zero-padded [2H,4H] weight consumes [ph|pc] directly (no slice).
            xg = xr[:, i:i + 1] * wih_ref[i] + bg_ref[i]              # [B, 4H]
            gates = xg + jnp.dot(proc.astype(jnp.bfloat16), whh_ref[i],
                                 preferred_element_type=jnp.float32)  # [B, 4H]

            # Single EUP pass: g-gate pre-activations were pre-scaled by 2, so
            # tanh(g) = 2*sigmoid(2g) - 1 comes out of the same sigmoid tile.
            sg = jax.nn.sigmoid(gates)
            ig = sg[:, 0:H]
            fg = sg[:, H:2 * H]
            gg = 2.0 * sg[:, 2 * H:3 * H] - 1.0
            og = sg[:, 3 * H:4 * H]

            c_new = fg * pc + ig * gg
            h_new = og * jnp.tanh(c_new)
            hc[i] = jnp.concatenate([h_new, c_new], axis=1)           # [B, 2H]
        return tuple(hc)

    init = tuple(jnp.zeros((B, 2 * H), jnp.float32) for _ in range(L))
    hc_fin = jax.lax.fori_loop(0, R, round_body, init)

    final_h = hc_fin[L - 1][:, 0:H]                                   # [B, H]

    # Epilogue (runs once): fc_out Linear + ReLU, BatchNorm1d (batch stats), sigmoid.
    o_lin = jnp.maximum(
        jnp.dot(final_h.astype(jnp.bfloat16), wout_ref[...],
                preferred_element_type=jnp.float32) + bout_ref[...],
        0.0,
    )                                                                 # [B, O]
    mu = jnp.mean(o_lin, axis=0, keepdims=True)
    var = jnp.mean((o_lin - mu) ** 2, axis=0, keepdims=True)
    o_bn = gamma_ref[...] * (o_lin - mu) * jax.lax.rsqrt(var + 1e-5) + beta_ref[...]

    out_ref[...] = jax.nn.sigmoid(o_bn)
    hfin_ref[...] = final_h


def prepare_kernel_params(params):
    """One-time fusion / padding / pre-scaling of weights for the kernel."""
    whp = params["whp"]                     # [L, 2H, H]
    wcp = params["wcp"]                     # [L, 2H, H]
    L, _, H = whp.shape

    # Block-diagonal fused processor weight; LHS row blocks are the packed-state
    # order [h_in | c_in | h_prev | c_prev], output cols [ph | pc].
    wproc = jnp.zeros((L, 4 * H, 2 * H), jnp.float32)
    wproc = wproc.at[:, 0:H, 0:H].set(whp[:, 0:H])                # h_in   -> ph
    wproc = wproc.at[:, H:2 * H, H:2 * H].set(wcp[:, 0:H])        # c_in   -> pc
    wproc = wproc.at[:, 2 * H:3 * H, 0:H].set(whp[:, H:2 * H])    # h_prev -> ph
    wproc = wproc.at[:, 3 * H:4 * H, H:2 * H].set(wcp[:, H:2 * H])  # c_prev -> pc
    bproc = jnp.concatenate([params["bhp"], params["bcp"]], axis=-1)[:, None, :]  # [L,1,2H]

    # Pre-scale the g-gate (cols 2H:3H) by 2 so the kernel needs only one
    # sigmoid pass: tanh(g) = 2*sigmoid(2g) - 1.
    gscale = jnp.ones((4 * H,), jnp.float32).at[2 * H:3 * H].set(2.0)
    wih = (params["wih"] * gscale)[:, None, :]                    # [L, 1, 4H]
    bg = (params["blstm"] * gscale)[:, None, :]                   # [L, 1, 4H]
    whh = params["whh"] * gscale                                  # [L, H, 4H]
    # Zero-pad rows H:2H so the gate matmul consumes [ph | pc] without a slice.
    whh_p = jnp.zeros((L, 2 * H, 4 * H), jnp.float32).at[:, 0:H, :].set(whh)

    return dict(
        wproc=wproc.astype(jnp.bfloat16),
        bproc=bproc,
        whh=whh_p.astype(jnp.bfloat16),
        wih=wih,
        bg=bg,
        wout=params["wout"].astype(jnp.bfloat16),
        bout=params["bout"],
        gamma=params["gamma"],
        beta=params["beta"],
    )


@jax.jit
def block_rnn_forward(x, kp):
    """x: [batch, num_rounds, chain_length] (PyTorch layout). Returns (output, h_ext)."""
    B, R, L = x.shape
    H = kp["whh"].shape[1] // 2
    O = kp["wout"].shape[1]

    # [R, B, L]: round index becomes a leading-axis dynamic index inside the
    # kernel's fori_loop; the per-cell scalar is then a static lane slice.
    x_k = jnp.transpose(x.astype(jnp.float32), (1, 0, 2))

    vmem = pl.BlockSpec(memory_space=pltpu.MemorySpace.VMEM)
    kernel = functools.partial(_block_rnn_kernel, R=R, L=L, H=H)

    out, h_final = pl.pallas_call(
        kernel,
        out_shape=(
            jax.ShapeDtypeStruct((B, O), jnp.float32),
            jax.ShapeDtypeStruct((B, H), jnp.float32),
        ),
        in_specs=[vmem] * 10,
        out_specs=(vmem, vmem),
    )(
        x_k,
        kp["wproc"], kp["bproc"], kp["whh"], kp["wih"], kp["bg"],
        kp["wout"], kp["bout"], kp["gamma"], kp["beta"],
    )
    return out, h_final


def init_params(key, input_size, hidden_size, output_size, chain_length):
    """Deterministic PyTorch-style uniform(-1/sqrt(fan_in), 1/sqrt(fan_in)) init."""
    assert input_size == 1, "module's forward only works with input_size == 1"
    H, L, O = hidden_size, chain_length, output_size
    keys = jax.random.split(key, 10)

    def uni(k, shape, fan_in):
        bound = 1.0 / float(fan_in) ** 0.5
        return jax.random.uniform(k, shape, jnp.float32, -bound, bound)

    params = dict(
        # per-cell hidden/cell processors: Linear(2H -> H) (+ ReLU), weights pre-transposed
        whp=uni(keys[0], (L, 2 * H, H), 2 * H),
        bhp=uni(keys[1], (L, H), 2 * H),
        wcp=uni(keys[2], (L, 2 * H, H), 2 * H),
        bcp=uni(keys[3], (L, H), 2 * H),
        # per-cell LSTMCell(input_size=1, hidden_size=H)
        wih=uni(keys[4], (L, 4 * H), H),
        whh=uni(keys[5], (L, H, 4 * H), H),
        blstm=uni(keys[6], (L, 4 * H), H) + uni(keys[7], (L, 4 * H), H),
        # fc_out: Linear(H -> O) (+ ReLU)
        wout=uni(keys[8], (H, O), H),
        bout=uni(keys[9], (1, O), H),
        # BatchNorm1d(O) defaults
        gamma=jnp.ones((1, O), jnp.float32),
        beta=jnp.zeros((1, O), jnp.float32),
    )
    return params


if __name__ == "__main__":
    B, H, O, L, R = 2, 32, 4, 8, 3          # batch, hidden, output, chain_length, num_rounds
    input_size = 1

    key = jax.random.PRNGKey(0)
    pkey, xkey = jax.random.split(key)
    params = init_params(pkey, input_size, H, O, L)
    kparams = prepare_kernel_params(params)  # one-time weight fusion, off the per-call path
    x = jax.random.normal(xkey, (B, R, L), jnp.float32)   # [batch, num_rounds, chain_length]

    out, h_ext = block_rnn_forward(x, kparams)
    jax.block_until_ready((out, h_ext))
    assert out.shape == (B, O) and h_ext.shape == (B, H)
    assert bool(jnp.all(jnp.isfinite(out))) and bool(jnp.all(jnp.isfinite(h_ext)))
    print("KERNEL_OK")
</pallas_src>

<mosaic_0001>
module attributes {stable_mosaic.version = 11 : i64} {
  func.func @_block_rnn_kernel(%arg0: memref<3x2x8xf32, #tpu.memory_space<vmem>>, %arg1: memref<8x128x64xbf16, #tpu.memory_space<vmem>>, %arg2: memref<8x1x64xf32, #tpu.memory_space<vmem>>, %arg3: memref<8x64x128xbf16, #tpu.memory_space<vmem>>, %arg4: memref<8x1x128xf32, #tpu.memory_space<vmem>>, %arg5: memref<8x1x128xf32, #tpu.memory_space<vmem>>, %arg6: memref<32x4xbf16, #tpu.memory_space<vmem>>, %arg7: memref<1x4xf32, #tpu.memory_space<vmem>>, %arg8: memref<1x4xf32, #tpu.memory_space<vmem>>, %arg9: memref<1x4xf32, #tpu.memory_space<vmem>>, %arg10: memref<2x4xf32, #tpu.memory_space<vmem>>, %arg11: memref<2x32xf32, #tpu.memory_space<vmem>>) attributes {dimension_semantics = [], scalar_prefetch = 0 : i64, scratch_operands = 0 : i64, tpu.core_type = #tpu.core_type<tc>} {
    %cst = arith.constant 0.000000e+00 : f32
    %0 = vector.broadcast %cst : f32 to vector<2x64xf32>
    %cst_0 = arith.constant 0.000000e+00 : f32
    %1 = vector.broadcast %cst_0 : f32 to vector<2x64xf32>
    %cst_1 = arith.constant 0.000000e+00 : f32
    %2 = vector.broadcast %cst_1 : f32 to vector<2x64xf32>
    %cst_2 = arith.constant 0.000000e+00 : f32
    %3 = vector.broadcast %cst_2 : f32 to vector<2x64xf32>
    %cst_3 = arith.constant 0.000000e+00 : f32
    %4 = vector.broadcast %cst_3 : f32 to vector<2x64xf32>
    %cst_4 = arith.constant 0.000000e+00 : f32
    %5 = vector.broadcast %cst_4 : f32 to vector<2x64xf32>
    %cst_5 = arith.constant 0.000000e+00 : f32
    %6 = vector.broadcast %cst_5 : f32 to vector<2x64xf32>
    %cst_6 = arith.constant 0.000000e+00 : f32
    %7 = vector.broadcast %cst_6 : f32 to vector<2x64xf32>
    %c0_i32 = arith.constant 0 : i32
    %c3_i32 = arith.constant 3 : i32
    %8 = arith.addi %c0_i32, %c3_i32 : i32
    %c1_i32 = arith.constant 1 : i32
    %9:8 = scf.for %arg12 = %c0_i32 to %8 step %c1_i32 iter_args(%arg13 = %0, %arg14 = %1, %arg15 = %2, %arg16 = %3, %arg17 = %4, %arg18 = %5, %arg19 = %6, %arg20 = %7) -> (vector<2x64xf32>, vector<2x64xf32>, vector<2x64xf32>, vector<2x64xf32>, vector<2x64xf32>, vector<2x64xf32>, vector<2x64xf32>, vector<2x64xf32>)  : i32 {
      %50 = arith.index_cast %arg12 : i32 to index
      %c0_27 = arith.constant 0 : index
      %c0_28 = arith.constant 0 : index
      %51 = vector.load %arg0[%50, %c0_27, %c0_28] : memref<3x2x8xf32, #tpu.memory_space<vmem>>, vector<1x2x8xf32>
      %52 = vector.shape_cast %51 : vector<1x2x8xf32> to vector<2x8xf32>
      %53 = tpu.concatenate %arg20, %arg13 in 1 : vector<2x64xf32>, vector<2x64xf32> -> vector<2x128xf32>
      %54 = arith.truncf %53 : vector<2x128xf32> to vector<2x128xbf16>
      %c0_29 = arith.constant 0 : index
      %c0_30 = arith.constant 0 : index
      %c0_31 = arith.constant 0 : index
      %55 = vector.load %arg1[%c0_29, %c0_30, %c0_31] : memref<8x128x64xbf16, #tpu.memory_space<vmem>>, vector<1x128x64xbf16>
      %56 = vector.shape_cast %55 : vector<1x128x64xbf16> to vector<128x64xbf16>
      %cst_32 = arith.constant dense<0.000000e+00> : vector<2x64xf32>
      %57 = tpu.matmul %54, %56, %cst_32 {dimension_numbers = #tpu.dot_dimension_numbers<[1], [0], [0], [1], [0, 0, 1, 1], [], []>} : vector<2x128xbf16>, vector<128x64xbf16>, vector<2x64xf32> -> vector<2x64xf32>
      %c0_33 = arith.constant 0 : index
      %c0_34 = arith.constant 0 : index
      %c0_35 = arith.constant 0 : index
      %58 = vector.load %arg2[%c0_33, %c0_34, %c0_35] : memref<8x1x64xf32, #tpu.memory_space<vmem>>, vector<1x1x64xf32>
      %59 = vector.shape_cast %58 : vector<1x1x64xf32> to vector<1x64xf32>
      %60 = vector.broadcast %59 : vector<1x64xf32> to vector<2x64xf32>
      %61 = arith.addf %57, %60 : vector<2x64xf32>
      %cst_36 = arith.constant 0.000000e+00 : f32
      %62 = vector.broadcast %cst_36 : f32 to vector<2x64xf32>
      %63 = arith.maximumf %61, %62 : vector<2x64xf32>
      %64 = vector.extract_strided_slice %63 {offsets = [0, 32], sizes = [2, 32], strides = [1, 1]} : vector<2x64xf32> to vector<2x32xf32>
      %65 = vector.extract_strided_slice %52 {offsets = [0, 0], sizes = [2, 1], strides = [1, 1]} : vector<2x8xf32> to vector<2x1xf32>
      %c0_37 = arith.constant 0 : index
      %c0_38 = arith.constant 0 : index
      %c0_39 = arith.constant 0 : index
      %66 = vector.load %arg4[%c0_37, %c0_38, %c0_39] : memref<8x1x128xf32, #tpu.memory_space<vmem>>, vector<1x1x128xf32>
      %67 = vector.shape_cast %66 : vector<1x1x128xf32> to vector<1x128xf32>
      %68 = vector.broadcast %65 : vector<2x1xf32> to vector<2x128xf32>
      %69 = vector.broadcast %67 : vector<1x128xf32> to vector<2x128xf32>
      %70 = arith.mulf %68, %69 : vector<2x128xf32>
      %c0_40 = arith.constant 0 : index
      %c0_41 = arith.constant 0 : index
      %c0_42 = arith.constant 0 : index
      %71 = vector.load %arg5[%c0_40, %c0_41, %c0_42] : memref<8x1x128xf32, #tpu.memory_space<vmem>>, vector<1x1x128xf32>
      %72 = vector.shape_cast %71 : vector<1x1x128xf32> to vector<1x128xf32>
      %73 = vector.broadcast %72 : vector<1x128xf32> to vector<2x128xf32>
      %74 = arith.addf %70, %73 : vector<2x128xf32>
      %75 = arith.truncf %63 : vector<2x64xf32> to vector<2x64xbf16>
      %c0_43 = arith.constant 0 : index
      %c0_44 = arith.constant 0 : index
      %c0_45 = arith.constant 0 : index
      %76 = vector.load %arg3[%c0_43, %c0_44, %c0_45] : memref<8x64x128xbf16, #tpu.memory_space<vmem>>, vector<1x64x128xbf16>
      %77 = vector.shape_cast %76 : vector<1x64x128xbf16> to vector<64x128xbf16>
      %cst_46 = arith.constant dense<0.000000e+00> : vector<2x128xf32>
      %78 = tpu.matmul %75, %77, %cst_46 {dimension_numbers = #tpu.dot_dimension_numbers<[1], [0], [0], [1], [0, 0, 1, 1], [], []>} : vector<2x64xbf16>, vector<64x128xbf16>, vector<2x128xf32> -> vector<2x128xf32>
      %79 = arith.addf %74, %78 : vector<2x128xf32>
      %80 = arith.negf %79 : vector<2x128xf32>
      %81 = math.exp %80 : vector<2x128xf32>
      %cst_47 = arith.constant 1.000000e+00 : f32
      %82 = vector.broadcast %cst_47 : f32 to vector<2x128xf32>
      %83 = arith.addf %82, %81 : vector<2x128xf32>
      %84 = arith.divf %82, %83 : vector<2x128xf32>
      %85 = vector.extract_strided_slice %84 {offsets = [0, 0], sizes = [2, 32], strides = [1, 1]} : vector<2x128xf32> to vector<2x32xf32>
      %86 = vector.extract_strided_slice %84 {offsets = [0, 32], sizes = [2, 32], strides = [1, 1]} : vector<2x128xf32> to vector<2x32xf32>
      %87 = vector.extract_strided_slice %84 {offsets = [0, 64], sizes = [2, 32], strides = [1, 1]} : vector<2x128xf32> to vector<2x32xf32>
      %cst_48 = arith.constant 2.000000e+00 : f32
      %88 = vector.broadcast %cst_48 : f32 to vector<2x32xf32>
      %89 = arith.mulf %88, %87 : vector<2x32xf32>
      %cst_49 = arith.constant 1.000000e+00 : f32
      %90 = vector.broadcast %cst_49 : f32 to vector<2x32xf32>
      %91 = arith.subf %89, %90 : vector<2x32xf32>
      %92 = vector.extract_strided_slice %84 {offsets = [0, 96], sizes = [2, 32], strides = [1, 1]} : vector<2x128xf32> to vector<2x32xf32>
      %93 = arith.mulf %86, %64 : vector<2x32xf32>
      %94 = arith.mulf %85, %91 : vector<2x32xf32>
      %95 = arith.addf %93, %94 : vector<2x32xf32>
      %96 = math.tanh %95 : vector<2x32xf32>
      %97 = arith.mulf %92, %96 : vector<2x32xf32>
      %98 = tpu.concatenate %97, %95 in 1 : vector<2x32xf32>, vector<2x32xf32> -> vector<2x64xf32>
      %99 = tpu.concatenate %98, %arg14 in 1 : vector<2x64xf32>, vector<2x64xf32> -> vector<2x128xf32>
      %100 = arith.truncf %99 : vector<2x128xf32> to vector<2x128xbf16>
      %c1 = arith.constant 1 : index
      %c0_50 = arith.constant 0 : index
      %c0_51 = arith.constant 0 : index
      %101 = vector.load %arg1[%c1, %c0_50, %c0_51] : memref<8x128x64xbf16, #tpu.memory_space<vmem>>, vector<1x128x64xbf16>
      %102 = vector.shape_cast %101 : vector<1x128x64xbf16> to vector<128x64xbf16>
      %cst_52 = arith.constant dense<0.000000e+00> : vector<2x64xf32>
      %103 = tpu.matmul %100, %102, %cst_52 {dimension_numbers = #tpu.dot_dimension_numbers<[1], [0], [0], [1], [0, 0, 1, 1], [], []>} : vector<2x128xbf16>, vector<128x64xbf16>, vector<2x64xf32> -> vector<2x64xf32>
      %c1_53 = arith.constant 1 : index
      %c0_54 = arith.constant 0 : index
      %c0_55 = arith.constant 0 : index
      %104 = vector.load %arg2[%c1_53, %c0_54, %c0_55] : memref<8x1x64xf32, #tpu.memory_space<vmem>>, vector<1x1x64xf32>
      %105 = vector.shape_cast %104 : vector<1x1x64xf32> to vector<1x64xf32>
      %106 = vector.broadcast %105 : vector<1x64xf32> to vector<2x64xf32>
      %107 = arith.addf %103, %106 : vector<2x64xf32>
      %cst_56 = arith.constant 0.000000e+00 : f32
      %108 = vector.broadcast %cst_56 : f32 to vector<2x64xf32>
      %109 = arith.maximumf %107, %108 : vector<2x64xf32>
      %110 = vector.extract_strided_slice %109 {offsets = [0, 32], sizes = [2, 32], strides = [1, 1]} : vector<2x64xf32> to vector<2x32xf32>
      %111 = vector.extract_strided_slice %52 {offsets = [0, 1], sizes = [2, 1], strides = [1, 1]} : vector<2x8xf32> to vector<2x1xf32>
      %c1_57 = arith.constant 1 : index
      %c0_58 = arith.constant 0 : index
      %c0_59 = arith.constant 0 : index
      %112 = vector.load %arg4[%c1_57, %c0_58, %c0_59] : memref<8x1x128xf32, #tpu.memory_space<vmem>>, vector<1x1x128xf32>
      %113 = vector.shape_cast %112 : vector<1x1x128xf32> to vector<1x128xf32>
      %114 = vector.broadcast %111 : vector<2x1xf32> to vector<2x128xf32>
      %115 = vector.broadcast %113 : vector<1x128xf32> to vector<2x128xf32>
      %116 = arith.mulf %114, %115 : vector<2x128xf32>
      %c1_60 = arith.constant 1 : index
      %c0_61 = arith.constant 0 : index
      %c0_62 = arith.constant 0 : index
      %117 = vector.load %arg5[%c1_60, %c0_61, %c0_62] : memref<8x1x128xf32, #tpu.memory_space<vmem>>, vector<1x1x128xf32>
      %118 = vector.shape_cast %117 : vector<1x1x128xf32> to vector<1x128xf32>
      %119 = vector.broadcast %118 : vector<1x128xf32> to vector<2x128xf32>
      %120 = arith.addf %116, %119 : vector<2x128xf32>
      %121 = arith.truncf %109 : vector<2x64xf32> to vector<2x64xbf16>
      %c1_63 = arith.constant 1 : index
      %c0_64 = arith.constant 0 : index
      %c0_65 = arith.constant 0 : index
      %122 = vector.load %arg3[%c1_63, %c0_64, %c0_65] : memref<8x64x128xbf16, #tpu.memory_space<vmem>>, vector<1x64x128xbf16>
      %123 = vector.shape_cast %122 : vector<1x64x128xbf16> to vector<64x128xbf16>
      %cst_66 = arith.constant dense<0.000000e+00> : vector<2x128xf32>
      %124 = tpu.matmul %121, %123, %cst_66 {dimension_numbers = #tpu.dot_dimension_numbers<[1], [0], [0], [1], [0, 0, 1, 1], [], []>} : vector<2x64xbf16>, vector<64x128xbf16>, vector<2x128xf32> -> vector<2x128xf32>
      %125 = arith.addf %120, %124 : vector<2x128xf32>
      %126 = arith.negf %125 : vector<2x128xf32>
      %127 = math.exp %126 : vector<2x128xf32>
      %cst_67 = arith.constant 1.000000e+00 : f32
      %128 = vector.broadcast %cst_67 : f32 to vector<2x128xf32>
      %129 = arith.addf %128, %127 : vector<2x128xf32>
      %130 = arith.divf %128, %129 : vector<2x128xf32>
      %131 = vector.extract_strided_slice %130 {offsets = [0, 0], sizes = [2, 32], strides = [1, 1]} : vector<2x128xf32> to vector<2x32xf32>
      %132 = vector.extract_strided_slice %130 {offsets = [0, 32], sizes = [2, 32], strides = [1, 1]} : vector<2x128xf32> to vector<2x32xf32>
      %133 = vector.extract_strided_slice %130 {offsets = [0, 64], sizes = [2, 32], strides = [1, 1]} : vector<2x128xf32> to vector<2x32xf32>
      %cst_68 = arith.constant 2.000000e+00 : f32
      %134 = vector.broadcast %cst_68 : f32 to vector<2x32xf32>
      %135 = arith.mulf %134, %133 : vector<2x32xf32>
      %cst_69 = arith.constant 1.000000e+00 : f32
      %136 = vector.broadcast %cst_69 : f32 to vector<2x32xf32>
      %137 = arith.subf %135, %136 : vector<2x32xf32>
      %138 = vector.extract_strided_slice %130 {offsets = [0, 96], sizes = [2, 32], strides = [1, 1]} : vector<2x128xf32> to vector<2x32xf32>
      %139 = arith.mulf %132, %110 : vector<2x32xf32>
      %140 = arith.mulf %131, %137 : vector<2x32xf32>
      %141 = arith.addf %139, %140 : vector<2x32xf32>
      %142 = math.tanh %141 : vector<2x32xf32>
      %143 = arith.mulf %138, %142 : vector<2x32xf32>
      %144 = tpu.concatenate %143, %141 in 1 : vector<2x32xf32>, vector<2x32xf32> -> vector<2x64xf32>
      %145 = tpu.concatenate %144, %arg15 in 1 : vector<2x64xf32>, vector<2x64xf32> -> vector<2x128xf32>
      %146 = arith.truncf %145 : vector<2x128xf32> to vector<2x128xbf16>
      %c2 = arith.constant 2 : index
      %c0_70 = arith.constant 0 : index
      %c0_71 = arith.constant 0 : index
      %147 = vector.load %arg1[%c2, %c0_70, %c0_71] : memref<8x128x64xbf16, #tpu.memory_space<vmem>>, vector<1x128x64xbf16>
      %148 = vector.shape_cast %147 : vector<1x128x64xbf16> to vector<128x64xbf16>
      %cst_72 = arith.constant dense<0.000000e+00> : vector<2x64xf32>
      %149 = tpu.matmul %146, %148, %cst_72 {dimension_numbers = #tpu.dot_dimension_numbers<[1], [0], [0], [1], [0, 0, 1, 1], [], []>} : vector<2x128xbf16>, vector<128x64xbf16>, vector<2x64xf32> -> vector<2x64xf32>
      %c2_73 = arith.constant 2 : index
      %c0_74 = arith.constant 0 : index
      %c0_75 = arith.constant 0 : index
      %150 = vector.load %arg2[%c2_73, %c0_74, %c0_75] : memref<8x1x64xf32, #tpu.memory_space<vmem>>, vector<1x1x64xf32>
      %151 = vector.shape_cast %150 : vector<1x1x64xf32> to vector<1x64xf32>
      %152 = vector.broadcast %151 : vector<1x64xf32> to vector<2x64xf32>
      %153 = arith.addf %149, %152 : vector<2x64xf32>
      %cst_76 = arith.constant 0.000000e+00 : f32
      %154 = vector.broadcast %cst_76 : f32 to vector<2x64xf32>
      %155 = arith.maximumf %153, %154 : vector<2x64xf32>
      %156 = vector.extract_strided_slice %155 {offsets = [0, 32], sizes = [2, 32], strides = [1, 1]} : vector<2x64xf32> to vector<2x32xf32>
      %157 = vector.extract_strided_slice %52 {offsets = [0, 2], sizes = [2, 1], strides = [1, 1]} : vector<2x8xf32> to vector<2x1xf32>
      %c2_77 = arith.constant 2 : index
      %c0_78 = arith.constant 0 : index
      %c0_79 = arith.constant 0 : index
      %158 = vector.load %arg4[%c2_77, %c0_78, %c0_79] : memref<8x1x128xf32, #tpu.memory_space<vmem>>, vector<1x1x128xf32>
      %159 = vector.shape_cast %158 : vector<1x1x128xf32> to vector<1x128xf32>
      %160 = vector.broadcast %157 : vector<2x1xf32> to vector<2x128xf32>
      %161 = vector.broadcast %159 : vector<1x128xf32> to vector<2x128xf32>
      %162 = arith.mulf %160, %161 : vector<2x128xf32>
      %c2_80 = arith.constant 2 : index
      %c0_81 = arith.constant 0 : index
      %c0_82 = arith.constant 0 : index
      %163 = vector.load %arg5[%c2_80, %c0_81, %c0_82] : memref<8x1x128xf32, #tpu.memory_space<vmem>>, vector<1x1x128xf32>
      %164 = vector.shape_cast %163 : vector<1x1x128xf32> to vector<1x128xf32>
      %165 = vector.broadcast %164 : vector<1x128xf32> to vector<2x128xf32>
      %166 = arith.addf %162, %165 : vector<2x128xf32>
      %167 = arith.truncf %155 : vector<2x64xf32> to vector<2x64xbf16>
      %c2_83 = arith.constant 2 : index
      %c0_84 = arith.constant 0 : index
      %c0_85 = arith.constant 0 : index
      %168 = vector.load %arg3[%c2_83, %c0_84, %c0_85] : memref<8x64x128xbf16, #tpu.memory_space<vmem>>, vector<1x64x128xbf16>
      %169 = vector.shape_cast %168 : vector<1x64x128xbf16> to vector<64x128xbf16>
      %cst_86 = arith.constant dense<0.000000e+00> : vector<2x128xf32>
      %170 = tpu.matmul %167, %169, %cst_86 {dimension_numbers = #tpu.dot_dimension_numbers<[1], [0], [0], [1], [0, 0, 1, 1], [], []>} : vector<2x64xbf16>, vector<64x128xbf16>, vector<2x128xf32> -> vector<2x128xf32>
      %171 = arith.addf %166, %170 : vector<2x128xf32>
      %172 = arith.negf %171 : vector<2x128xf32>
      %173 = math.exp %172 : vector<2x128xf32>
      %cst_87 = arith.constant 1.000000e+00 : f32
      %174 = vector.broadcast %cst_87 : f32 to vector<2x128xf32>
      %175 = arith.addf %174, %173 : vector<2x128xf32>
      %176 = arith.divf %174, %175 : vector<2x128xf32>
      %177 = vector.extract_strided_slice %176 {offsets = [0, 0], sizes = [2, 32], strides = [1, 1]} : vector<2x128xf32> to vector<2x32xf32>
      %178 = vector.extract_strided_slice %176 {offsets = [0, 32], sizes = [2, 32], strides = [1, 1]} : vector<2x128xf32> to vector<2x32xf32>
      %179 = vector.extract_strided_slice %176 {offsets = [0, 64], sizes = [2, 32], strides = [1, 1]} : vector<2x128xf32> to vector<2x32xf32>
      %cst_88 = arith.constant 2.000000e+00 : f32
      %180 = vector.broadcast %cst_88 : f32 to vector<2x32xf32>
      %181 = arith.mulf %180, %179 : vector<2x32xf32>
      %cst_89 = arith.constant 1.000000e+00 : f32
      %182 = vector.broadcast %cst_89 : f32 to vector<2x32xf32>
      %183 = arith.subf %181, %182 : vector<2x32xf32>
      %184 = vector.extract_strided_slice %176 {offsets = [0, 96], sizes = [2, 32], strides = [1, 1]} : vector<2x128xf32> to vector<2x32xf32>
      %185 = arith.mulf %178, %156 : vector<2x32xf32>
      %186 = arith.mulf %177, %183 : vector<2x32xf32>
      %187 = arith.addf %185, %186 : vector<2x32xf32>
      %188 = math.tanh %187 : vector<2x32xf32>
      %189 = arith.mulf %184, %188 : vector<2x32xf32>
      %190 = tpu.concatenate %189, %187 in 1 : vector<2x32xf32>, vector<2x32xf32> -> vector<2x64xf32>
      %191 = tpu.concatenate %190, %arg16 in 1 : vector<2x64xf32>, vector<2x64xf32> -> vector<2x128xf32>
      %192 = arith.truncf %191 : vector<2x128xf32> to vector<2x128xbf16>
      %c3 = arith.constant 3 : index
      %c0_90 = arith.constant 0 : index
      %c0_91 = arith.constant 0 : index
      %193 = vector.load %arg1[%c3, %c0_90, %c0_91] : memref<8x128x64xbf16, #tpu.memory_space<vmem>>, vector<1x128x64xbf16>
      %194 = vector.shape_cast %193 : vector<1x128x64xbf16> to vector<128x64xbf16>
      %cst_92 = arith.constant dense<0.000000e+00> : vector<2x64xf32>
      %195 = tpu.matmul %192, %194, %cst_92 {dimension_numbers = #tpu.dot_dimension_numbers<[1], [0], [0], [1], [0, 0, 1, 1], [], []>} : vector<2x128xbf16>, vector<128x64xbf16>, vector<2x64xf32> -> vector<2x64xf32>
      %c3_93 = arith.constant 3 : index
      %c0_94 = arith.constant 0 : index
      %c0_95 = arith.constant 0 : index
      %196 = vector.load %arg2[%c3_93, %c0_94, %c0_95] : memref<8x1x64xf32, #tpu.memory_space<vmem>>, vector<1x1x64xf32>
      %197 = vector.shape_cast %196 : vector<1x1x64xf32> to vector<1x64xf32>
      %198 = vector.broadcast %197 : vector<1x64xf32> to vector<2x64xf32>
      %199 = arith.addf %195, %198 : vector<2x64xf32>
      %cst_96 = arith.constant 0.000000e+00 : f32
      %200 = vector.broadcast %cst_96 : f32 to vector<2x64xf32>
      %201 = arith.maximumf %199, %200 : vector<2x64xf32>
      %202 = vector.extract_strided_slice %201 {offsets = [0, 32], sizes = [2, 32], strides = [1, 1]} : vector<2x64xf32> to vector<2x32xf32>
      %203 = vector.extract_strided_slice %52 {offsets = [0, 3], sizes = [2, 1], strides = [1, 1]} : vector<2x8xf32> to vector<2x1xf32>
      %c3_97 = arith.constant 3 : index
      %c0_98 = arith.constant 0 : index
      %c0_99 = arith.constant 0 : index
      %204 = vector.load %arg4[%c3_97, %c0_98, %c0_99] : memref<8x1x128xf32, #tpu.memory_space<vmem>>, vector<1x1x128xf32>
      %205 = vector.shape_cast %204 : vector<1x1x128xf32> to vector<1x128xf32>
      %206 = vector.broadcast %203 : vector<2x1xf32> to vector<2x128xf32>
      %207 = vector.broadcast %205 : vector<1x128xf32> to vector<2x128xf32>
      %208 = arith.mulf %206, %207 : vector<2x128xf32>
      %c3_100 = arith.constant 3 : index
      %c0_101 = arith.constant 0 : index
      %c0_102 = arith.constant 0 : index
      %209 = vector.load %arg5[%c3_100, %c0_101, %c0_102] : memref<8x1x128xf32, #tpu.memory_space<vmem>>, vector<1x1x128xf32>
      %210 = vector.shape_cast %209 : vector<1x1x128xf32> to vector<1x128xf32>
      %211 = vector.broadcast %210 : vector<1x128xf32> to vector<2x128xf32>
      %212 = arith.addf %208, %211 : vector<2x128xf32>
      %213 = arith.truncf %201 : vector<2x64xf32> to vector<2x64xbf16>
      %c3_103 = arith.constant 3 : index
      %c0_104 = arith.constant 0 : index
      %c0_105 = arith.constant 0 : index
      %214 = vector.load %arg3[%c3_103, %c0_104, %c0_105] : memref<8x64x128xbf16, #tpu.memory_space<vmem>>, vector<1x64x128xbf16>
      %215 = vector.shape_cast %214 : vector<1x64x128xbf16> to vector<64x128xbf16>
      %cst_106 = arith.constant dense<0.000000e+00> : vector<2x128xf32>
      %216 = tpu.matmul %213, %215, %cst_106 {dimension_numbers = #tpu.dot_dimension_numbers<[1], [0], [0], [1], [0, 0, 1, 1], [], []>} : vector<2x64xbf16>, vector<64x128xbf16>, vector<2x128xf32> -> vector<2x128xf32>
      %217 = arith.addf %212, %216 : vector<2x128xf32>
      %218 = arith.negf %217 : vector<2x128xf32>
      %219 = math.exp %218 : vector<2x128xf32>
      %cst_107 = arith.constant 1.000000e+00 : f32
      %220 = vector.broadcast %cst_107 : f32 to vector<2x128xf32>
      %221 = arith.addf %220, %219 : vector<2x128xf32>
      %222 = arith.divf %220, %221 : vector<2x128xf32>
      %223 = vector.extract_strided_slice %222 {offsets = [0, 0], sizes = [2, 32], strides = [1, 1]} : vector<2x128xf32> to vector<2x32xf32>
      %224 = vector.extract_strided_slice %222 {offsets = [0, 32], sizes = [2, 32], strides = [1, 1]} : vector<2x128xf32> to vector<2x32xf32>
      %225 = vector.extract_strided_slice %222 {offsets = [0, 64], sizes = [2, 32], strides = [1, 1]} : vector<2x128xf32> to vector<2x32xf32>
      %cst_108 = arith.constant 2.000000e+00 : f32
      %226 = vector.broadcast %cst_108 : f32 to vector<2x32xf32>
      %227 = arith.mulf %226, %225 : vector<2x32xf32>
      %cst_109 = arith.constant 1.000000e+00 : f32
      %228 = vector.broadcast %cst_109 : f32 to vector<2x32xf32>
      %229 = arith.subf %227, %228 : vector<2x32xf32>
      %230 = vector.extract_strided_slice %222 {offsets = [0, 96], sizes = [2, 32], strides = [1, 1]} : vector<2x128xf32> to vector<2x32xf32>
      %231 = arith.mulf %224, %202 : vector<2x32xf32>
      %232 = arith.mulf %223, %229 : vector<2x32xf32>
      %233 = arith.addf %231, %232 : vector<2x32xf32>
      %234 = math.tanh %233 : vector<2x32xf32>
      %235 = arith.mulf %230, %234 : vector<2x32xf32>
      %236 = tpu.concatenate %235, %233 in 1 : vector<2x32xf32>, vector<2x32xf32> -> vector<2x64xf32>
      %237 = tpu.concatenate %236, %arg17 in 1 : vector<2x64xf32>, vector<2x64xf32> -> vector<2x128xf32>
      %238 = arith.truncf %237 : vector<2x128xf32> to vector<2x128xbf16>
      %c4 = arith.constant 4 : index
      %c0_110 = arith.constant 0 : index
      %c0_111 = arith.constant 0 : index
      %239 = vector.load %arg1[%c4, %c0_110, %c0_111] : memref<8x128x64xbf16, #tpu.memory_space<vmem>>, vector<1x128x64xbf16>
      %240 = vector.shape_cast %239 : vector<1x128x64xbf16> to vector<128x64xbf16>
      %cst_112 = arith.constant dense<0.000000e+00> : vector<2x64xf32>
      %241 = tpu.matmul %238, %240, %cst_112 {dimension_numbers = #tpu.dot_dimension_numbers<[1], [0], [0], [1], [0, 0, 1, 1], [], []>} : vector<2x128xbf16>, vector<128x64xbf16>, vector<2x64xf32> -> vector<2x64xf32>
      %c4_113 = arith.constant 4 : index
      %c0_114 = arith.constant 0 : index
      %c0_115 = arith.constant 0 : index
      %242 = vector.load %arg2[%c4_113, %c0_114, %c0_115] : memref<8x1x64xf32, #tpu.memory_space<vmem>>, vector<1x1x64xf32>
      %243 = vector.shape_cast %242 : vector<1x1x64xf32> to vector<1x64xf32>
      %244 = vector.broadcast %243 : vector<1x64xf32> to vector<2x64xf32>
      %245 = arith.addf %241, %244 : vector<2x64xf32>
      %cst_116 = arith.constant 0.000000e+00 : f32
      %246 = vector.broadcast %cst_116 : f32 to vector<2x64xf32>
      %247 = arith.maximumf %245, %246 : vector<2x64xf32>
      %248 = vector.extract_strided_slice %247 {offsets = [0, 32], sizes = [2, 32], strides = [1, 1]} : vector<2x64xf32> to vector<2x32xf32>
      %249 = vector.extract_strided_slice %52 {offsets = [0, 4], sizes = [2, 1], strides = [1, 1]} : vector<2x8xf32> to vector<2x1xf32>
      %c4_117 = arith.constant 4 : index
      %c0_118 = arith.constant 0 : index
      %c0_119 = arith.constant 0 : index
      %250 = vector.load %arg4[%c4_117, %c0_118, %c0_119] : memref<8x1x128xf32, #tpu.memory_space<vmem>>, vector<1x1x128xf32>
      %251 = vector.shape_cast %250 : vector<1x1x128xf32> to vector<1x128xf32>
      %252 = vector.broadcast %249 : vector<2x1xf32> to vector<2x128xf32>
      %253 = vector.broadcast %251 : vector<1x128xf32> to vector<2x128xf32>
      %254 = arith.mulf %252, %253 : vector<2x128xf32>
      %c4_120 = arith.constant 4 : index
      %c0_121 = arith.constant 0 : index
      %c0_122 = arith.constant 0 : index
      %255 = vector.load %arg5[%c4_120, %c0_121, %c0_122] : memref<8x1x128xf32, #tpu.memory_space<vmem>>, vector<1x1x128xf32>
      %256 = vector.shape_cast %255 : vector<1x1x128xf32> to vector<1x128xf32>
      %257 = vector.broadcast %256 : vector<1x128xf32> to vector<2x128xf32>
      %258 = arith.addf %254, %257 : vector<2x128xf32>
      %259 = arith.truncf %247 : vector<2x64xf32> to vector<2x64xbf16>
      %c4_123 = arith.constant 4 : index
      %c0_124 = arith.constant 0 : index
      %c0_125 = arith.constant 0 : index
      %260 = vector.load %arg3[%c4_123, %c0_124, %c0_125] : memref<8x64x128xbf16, #tpu.memory_space<vmem>>, vector<1x64x128xbf16>
      %261 = vector.shape_cast %260 : vector<1x64x128xbf16> to vector<64x128xbf16>
      %cst_126 = arith.constant dense<0.000000e+00> : vector<2x128xf32>
      %262 = tpu.matmul %259, %261, %cst_126 {dimension_numbers = #tpu.dot_dimension_numbers<[1], [0], [0], [1], [0, 0, 1, 1], [], []>} : vector<2x64xbf16>, vector<64x128xbf16>, vector<2x128xf32> -> vector<2x128xf32>
      %263 = arith.addf %258, %262 : vector<2x128xf32>
      %264 = arith.negf %263 : vector<2x128xf32>
      %265 = math.exp %264 : vector<2x128xf32>
      %cst_127 = arith.constant 1.000000e+00 : f32
      %266 = vector.broadcast %cst_127 : f32 to vector<2x128xf32>
      %267 = arith.addf %266, %265 : vector<2x128xf32>
      %268 = arith.divf %266, %267 : vector<2x128xf32>
      %269 = vector.extract_strided_slice %268 {offsets = [0, 0], sizes = [2, 32], strides = [1, 1]} : vector<2x128xf32> to vector<2x32xf32>
      %270 = vector.extract_strided_slice %268 {offsets = [0, 32], sizes = [2, 32], strides = [1, 1]} : vector<2x128xf32> to vector<2x32xf32>
      %271 = vector.extract_strided_slice %268 {offsets = [0, 64], sizes = [2, 32], strides = [1, 1]} : vector<2x128xf32> to vector<2x32xf32>
      %cst_128 = arith.constant 2.000000e+00 : f32
      %272 = vector.broadcast %cst_128 : f32 to vector<2x32xf32>
      %273 = arith.mulf %272, %271 : vector<2x32xf32>
      %cst_129 = arith.constant 1.000000e+00 : f32
      %274 = vector.broadcast %cst_129 : f32 to vector<2x32xf32>
      %275 = arith.subf %273, %274 : vector<2x32xf32>
      %276 = vector.extract_strided_slice %268 {offsets = [0, 96], sizes = [2, 32], strides = [1, 1]} : vector<2x128xf32> to vector<2x32xf32>
      %277 = arith.mulf %270, %248 : vector<2x32xf32>
      %278 = arith.mulf %269, %275 : vector<2x32xf32>
      %279 = arith.addf %277, %278 : vector<2x32xf32>
      %280 = math.tanh %279 : vector<2x32xf32>
      %281 = arith.mulf %276, %280 : vector<2x32xf32>
      %282 = tpu.concatenate %281, %279 in 1 : vector<2x32xf32>, vector<2x32xf32> -> vector<2x64xf32>
      %283 = tpu.concatenate %282, %arg18 in 1 : vector<2x64xf32>, vector<2x64xf32> -> vector<2x128xf32>
      %284 = arith.truncf %283 : vector<2x128xf32> to vector<2x128xbf16>
      %c5 = arith.constant 5 : index
      %c0_130 = arith.constant 0 : index
      %c0_131 = arith.constant 0 : index
      %285 = vector.load %arg1[%c5, %c0_130, %c0_131] : memref<8x128x64xbf16, #tpu.memory_space<vmem>>, vector<1x128x64xbf16>
      %286 = vector.shape_cast %285 : vector<1x128x64xbf16> to vector<128x64xbf16>
      %cst_132 = arith.constant dense<0.000000e+00> : vector<2x64xf32>
      %287 = tpu.matmul %284, %286, %cst_132 {dimension_numbers = #tpu.dot_dimension_numbers<[1], [0], [0], [1], [0, 0, 1, 1], [], []>} : vector<2x128xbf16>, vector<128x64xbf16>, vector<2x64xf32> -> vector<2x64xf32>
      %c5_133 = arith.constant 5 : index
      %c0_134 = arith.constant 0 : index
      %c0_135 = arith.constant 0 : index
      %288 = vector.load %arg2[%c5_133, %c0_134, %c0_135] : memref<8x1x64xf32, #tpu.memory_space<vmem>>, vector<1x1x64xf32>
      %289 = vector.shape_cast %288 : vector<1x1x64xf32> to vector<1x64xf32>
      %290 = vector.broadcast %289 : vector<1x64xf32> to vector<2x64xf32>
      %291 = arith.addf %287, %290 : vector<2x64xf32>
      %cst_136 = arith.constant 0.000000e+00 : f32
      %292 = vector.broadcast %cst_136 : f32 to vector<2x64xf32>
      %293 = arith.maximumf %291, %292 : vector<2x64xf32>
      %294 = vector.extract_strided_slice %293 {offsets = [0, 32], sizes = [2, 32], strides = [1, 1]} : vector<2x64xf32> to vector<2x32xf32>
      %295 = vector.extract_strided_slice %52 {offsets = [0, 5], sizes = [2, 1], strides = [1, 1]} : vector<2x8xf32> to vector<2x1xf32>
      %c5_137 = arith.constant 5 : index
      %c0_138 = arith.constant 0 : index
      %c0_139 = arith.constant 0 : index
      %296 = vector.load %arg4[%c5_137, %c0_138, %c0_139] : memref<8x1x128xf32, #tpu.memory_space<vmem>>, vector<1x1x128xf32>
      %297 = vector.shape_cast %296 : vector<1x1x128xf32> to vector<1x128xf32>
      %298 = vector.broadcast %295 : vector<2x1xf32> to vector<2x128xf32>
      %299 = vector.broadcast %297 : vector<1x128xf32> to vector<2x128xf32>
      %300 = arith.mulf %298, %299 : vector<2x128xf32>
      %c5_140 = arith.constant 5 : index
      %c0_141 = arith.constant 0 : index
      %c0_142 = arith.constant 0 : index
      %301 = vector.load %arg5[%c5_140, %c0_141, %c0_142] : memref<8x1x128xf32, #tpu.memory_space<vmem>>, vector<1x1x128xf32>
      %302 = vector.shape_cast %301 : vector<1x1x128xf32> to vector<1x128xf32>
      %303 = vector.broadcast %302 : vector<1x128xf32> to vector<2x128xf32>
      %304 = arith.addf %300, %303 : vector<2x128xf32>
      %305 = arith.truncf %293 : vector<2x64xf32> to vector<2x64xbf16>
      %c5_143 = arith.constant 5 : index
      %c0_144 = arith.constant 0 : index
      %c0_145 = arith.constant 0 : index
      %306 = vector.load %arg3[%c5_143, %c0_144, %c0_145] : memref<8x64x128xbf16, #tpu.memory_space<vmem>>, vector<1x64x128xbf16>
      %307 = vector.shape_cast %306 : vector<1x64x128xbf16> to vector<64x128xbf16>
      %cst_146 = arith.constant dense<0.000000e+00> : vector<2x128xf32>
      %308 = tpu.matmul %305, %307, %cst_146 {dimension_numbers = #tpu.dot_dimension_numbers<[1], [0], [0], [1], [0, 0, 1, 1], [], []>} : vector<2x64xbf16>, vector<64x128xbf16>, vector<2x128xf32> -> vector<2x128xf32>
      %309 = arith.addf %304, %308 : vector<2x128xf32>
      %310 = arith.negf %309 : vector<2x128xf32>
      %311 = math.exp %310 : vector<2x128xf32>
      %cst_147 = arith.constant 1.000000e+00 : f32
      %312 = vector.broadcast %cst_147 : f32 to vector<2x128xf32>
      %313 = arith.addf %312, %311 : vector<2x128xf32>
      %314 = arith.divf %312, %313 : vector<2x128xf32>
      %315 = vector.extract_strided_slice %314 {offsets = [0, 0], sizes = [2, 32], strides = [1, 1]} : vector<2x128xf32> to vector<2x32xf32>
      %316 = vector.extract_strided_slice %314 {offsets = [0, 32], sizes = [2, 32], strides = [1, 1]} : vector<2x128xf32> to vector<2x32xf32>
      %317 = vector.extract_strided_slice %314 {offsets = [0, 64], sizes = [2, 32], strides = [1, 1]} : vector<2x128xf32> to vector<2x32xf32>
      %cst_148 = arith.constant 2.000000e+00 : f32
      %318 = vector.broadcast %cst_148 : f32 to vector<2x32xf32>
      %319 = arith.mulf %318, %317 : vector<2x32xf32>
      %cst_149 = arith.constant 1.000000e+00 : f32
      %320 = vector.broadcast %cst_149 : f32 to vector<2x32xf32>
      %321 = arith.subf %319, %320 : vector<2x32xf32>
      %322 = vector.extract_strided_slice %314 {offsets = [0, 96], sizes = [2, 32], strides = [1, 1]} : vector<2x128xf32> to vector<2x32xf32>
      %323 = arith.mulf %316, %294 : vector<2x32xf32>
      %324 = arith.mulf %315, %321 : vector<2x32xf32>
      %325 = arith.addf %323, %324 : vector<2x32xf32>
      %326 = math.tanh %325 : vector<2x32xf32>
      %327 = arith.mulf %322, %326 : vector<2x32xf32>
      %328 = tpu.concatenate %327, %325 in 1 : vector<2x32xf32>, vector<2x32xf32> -> vector<2x64xf32>
      %329 = tpu.concatenate %328, %arg19 in 1 : vector<2x64xf32>, vector<2x64xf32> -> vector<2x128xf32>
      %330 = arith.truncf %329 : vector<2x128xf32> to vector<2x128xbf16>
      %c6 = arith.constant 6 : index
      %c0_150 = arith.constant 0 : index
      %c0_151 = arith.constant 0 : index
      %331 = vector.load %arg1[%c6, %c0_150, %c0_151] : memref<8x128x64xbf16, #tpu.memory_space<vmem>>, vector<1x128x64xbf16>
      %332 = vector.shape_cast %331 : vector<1x128x64xbf16> to vector<128x64xbf16>
      %cst_152 = arith.constant dense<0.000000e+00> : vector<2x64xf32>
      %333 = tpu.matmul %330, %332, %cst_152 {dimension_numbers = #tpu.dot_dimension_numbers<[1], [0], [0], [1], [0, 0, 1, 1], [], []>} : vector<2x128xbf16>, vector<128x64xbf16>, vector<2x64xf32> -> vector<2x64xf32>
      %c6_153 = arith.constant 6 : index
      %c0_154 = arith.constant 0 : index
      %c0_155 = arith.constant 0 : index
      %334 = vector.load %arg2[%c6_153, %c0_154, %c0_155] : memref<8x1x64xf32, #tpu.memory_space<vmem>>, vector<1x1x64xf32>
      %335 = vector.shape_cast %334 : vector<1x1x64xf32> to vector<1x64xf32>
      %336 = vector.broadcast %335 : vector<1x64xf32> to vector<2x64xf32>
      %337 = arith.addf %333, %336 : vector<2x64xf32>
      %cst_156 = arith.constant 0.000000e+00 : f32
      %338 = vector.broadcast %cst_156 : f32 to vector<2x64xf32>
      %339 = arith.maximumf %337, %338 : vector<2x64xf32>
      %340 = vector.extract_strided_slice %339 {offsets = [0, 32], sizes = [2, 32], strides = [1, 1]} : vector<2x64xf32> to vector<2x32xf32>
      %341 = vector.extract_strided_slice %52 {offsets = [0, 6], sizes = [2, 1], strides = [1, 1]} : vector<2x8xf32> to vector<2x1xf32>
      %c6_157 = arith.constant 6 : index
      %c0_158 = arith.constant 0 : index
      %c0_159 = arith.constant 0 : index
      %342 = vector.load %arg4[%c6_157, %c0_158, %c0_159] : memref<8x1x128xf32, #tpu.memory_space<vmem>>, vector<1x1x128xf32>
      %343 = vector.shape_cast %342 : vector<1x1x128xf32> to vector<1x128xf32>
      %344 = vector.broadcast %341 : vector<2x1xf32> to vector<2x128xf32>
      %345 = vector.broadcast %343 : vector<1x128xf32> to vector<2x128xf32>
      %346 = arith.mulf %344, %345 : vector<2x128xf32>
      %c6_160 = arith.constant 6 : index
      %c0_161 = arith.constant 0 : index
      %c0_162 = arith.constant 0 : index
      %347 = vector.load %arg5[%c6_160, %c0_161, %c0_162] : memref<8x1x128xf32, #tpu.memory_space<vmem>>, vector<1x1x128xf32>
      %348 = vector.shape_cast %347 : vector<1x1x128xf32> to vector<1x128xf32>
      %349 = vector.broadcast %348 : vector<1x128xf32> to vector<2x128xf32>
      %350 = arith.addf %346, %349 : vector<2x128xf32>
      %351 = arith.truncf %339 : vector<2x64xf32> to vector<2x64xbf16>
      %c6_163 = arith.constant 6 : index
      %c0_164 = arith.constant 0 : index
      %c0_165 = arith.constant 0 : index
      %352 = vector.load %arg3[%c6_163, %c0_164, %c0_165] : memref<8x64x128xbf16, #tpu.memory_space<vmem>>, vector<1x64x128xbf16>
      %353 = vector.shape_cast %352 : vector<1x64x128xbf16> to vector<64x128xbf16>
      %cst_166 = arith.constant dense<0.000000e+00> : vector<2x128xf32>
      %354 = tpu.matmul %351, %353, %cst_166 {dimension_numbers = #tpu.dot_dimension_numbers<[1], [0], [0], [1], [0, 0, 1, 1], [], []>} : vector<2x64xbf16>, vector<64x128xbf16>, vector<2x128xf32> -> vector<2x128xf32>
      %355 = arith.addf %350, %354 : vector<2x128xf32>
      %356 = arith.negf %355 : vector<2x128xf32>
      %357 = math.exp %356 : vector<2x128xf32>
      %cst_167 = arith.constant 1.000000e+00 : f32
      %358 = vector.broadcast %cst_167 : f32 to vector<2x128xf32>
      %359 = arith.addf %358, %357 : vector<2x128xf32>
      %360 = arith.divf %358, %359 : vector<2x128xf32>
      %361 = vector.extract_strided_slice %360 {offsets = [0, 0], sizes = [2, 32], strides = [1, 1]} : vector<2x128xf32> to vector<2x32xf32>
      %362 = vector.extract_strided_slice %360 {offsets = [0, 32], sizes = [2, 32], strides = [1, 1]} : vector<2x128xf32> to vector<2x32xf32>
      %363 = vector.extract_strided_slice %360 {offsets = [0, 64], sizes = [2, 32], strides = [1, 1]} : vector<2x128xf32> to vector<2x32xf32>
      %cst_168 = arith.constant 2.000000e+00 : f32
      %364 = vector.broadcast %cst_168 : f32 to vector<2x32xf32>
      %365 = arith.mulf %364, %363 : vector<2x32xf32>
      %cst_169 = arith.constant 1.000000e+00 : f32
      %366 = vector.broadcast %cst_169 : f32 to vector<2x32xf32>
      %367 = arith.subf %365, %366 : vector<2x32xf32>
      %368 = vector.extract_strided_slice %360 {offsets = [0, 96], sizes = [2, 32], strides = [1, 1]} : vector<2x128xf32> to vector<2x32xf32>
      %369 = arith.mulf %362, %340 : vector<2x32xf32>
      %370 = arith.mulf %361, %367 : vector<2x32xf32>
      %371 = arith.addf %369, %370 : vector<2x32xf32>
      %372 = math.tanh %371 : vector<2x32xf32>
      %373 = arith.mulf %368, %372 : vector<2x32xf32>
      %374 = tpu.concatenate %373, %371 in 1 : vector<2x32xf32>, vector<2x32xf32> -> vector<2x64xf32>
      %375 = tpu.concatenate %374, %arg20 in 1 : vector<2x64xf32>, vector<2x64xf32> -> vector<2x128xf32>
      %376 = arith.truncf %375 : vector<2x128xf32> to vector<2x128xbf16>
      %c7 = arith.constant 7 : index
      %c0_170 = arith.constant 0 : index
      %c0_171 = arith.constant 0 : index
      %377 = vector.load %arg1[%c7, %c0_170, %c0_171] : memref<8x128x64xbf16, #tpu.memory_space<vmem>>, vector<1x128x64xbf16>
      %378 = vector.shape_cast %377 : vector<1x128x64xbf16> to vector<128x64xbf16>
      %cst_172 = arith.constant dense<0.000000e+00> : vector<2x64xf32>
      %379 = tpu.matmul %376, %378, %cst_172 {dimension_numbers = #tpu.dot_dimension_numbers<[1], [0], [0], [1], [0, 0, 1, 1], [], []>} : vector<2x128xbf16>, vector<128x64xbf16>, vector<2x64xf32> -> vector<2x64xf32>
      %c7_173 = arith.constant 7 : index
      %c0_174 = arith.constant 0 : index
      %c0_175 = arith.constant 0 : index
      %380 = vector.load %arg2[%c7_173, %c0_174, %c0_175] : memref<8x1x64xf32, #tpu.memory_space<vmem>>, vector<1x1x64xf32>
      %381 = vector.shape_cast %380 : vector<1x1x64xf32> to vector<1x64xf32>
      %382 = vector.broadcast %381 : vector<1x64xf32> to vector<2x64xf32>
      %383 = arith.addf %379, %382 : vector<2x64xf32>
      %cst_176 = arith.constant 0.000000e+00 : f32
      %384 = vector.broadcast %cst_176 : f32 to vector<2x64xf32>
      %385 = arith.maximumf %383, %384 : vector<2x64xf32>
      %386 = vector.extract_strided_slice %385 {offsets = [0, 32], sizes = [2, 32], strides = [1, 1]} : vector<2x64xf32> to vector<2x32xf32>
      %387 = vector.extract_strided_slice %52 {offsets = [0, 7], sizes = [2, 1], strides = [1, 1]} : vector<2x8xf32> to vector<2x1xf32>
      %c7_177 = arith.constant 7 : index
      %c0_178 = arith.constant 0 : index
      %c0_179 = arith.constant 0 : index
      %388 = vector.load %arg4[%c7_177, %c0_178, %c0_179] : memref<8x1x128xf32, #tpu.memory_space<vmem>>, vector<1x1x128xf32>
      %389 = vector.shape_cast %388 : vector<1x1x128xf32> to vector<1x128xf32>
      %390 = vector.broadcast %387 : vector<2x1xf32> to vector<2x128xf32>
      %391 = vector.broadcast %389 : vector<1x128xf32> to vector<2x128xf32>
      %392 = arith.mulf %390, %391 : vector<2x128xf32>
      %c7_180 = arith.constant 7 : index
      %c0_181 = arith.constant 0 : index
      %c0_182 = arith.constant 0 : index
      %393 = vector.load %arg5[%c7_180, %c0_181, %c0_182] : memref<8x1x128xf32, #tpu.memory_space<vmem>>, vector<1x1x128xf32>
      %394 = vector.shape_cast %393 : vector<1x1x128xf32> to vector<1x128xf32>
      %395 = vector.broadcast %394 : vector<1x128xf32> to vector<2x128xf32>
      %396 = arith.addf %392, %395 : vector<2x128xf32>
      %397 = arith.truncf %385 : vector<2x64xf32> to vector<2x64xbf16>
      %c7_183 = arith.constant 7 : index
      %c0_184 = arith.constant 0 : index
      %c0_185 = arith.constant 0 : index
      %398 = vector.load %arg3[%c7_183, %c0_184, %c0_185] : memref<8x64x128xbf16, #tpu.memory_space<vmem>>, vector<1x64x128xbf16>
      %399 = vector.shape_cast %398 : vector<1x64x128xbf16> to vector<64x128xbf16>
      %cst_186 = arith.constant dense<0.000000e+00> : vector<2x128xf32>
      %400 = tpu.matmul %397, %399, %cst_186 {dimension_numbers = #tpu.dot_dimension_numbers<[1], [0], [0], [1], [0, 0, 1, 1], [], []>} : vector<2x64xbf16>, vector<64x128xbf16>, vector<2x128xf32> -> vector<2x128xf32>
      %401 = arith.addf %396, %400 : vector<2x128xf32>
      %402 = arith.negf %401 : vector<2x128xf32>
      %403 = math.exp %402 : vector<2x128xf32>
      %cst_187 = arith.constant 1.000000e+00 : f32
      %404 = vector.broadcast %cst_187 : f32 to vector<2x128xf32>
      %405 = arith.addf %404, %403 : vector<2x128xf32>
      %406 = arith.divf %404, %405 : vector<2x128xf32>
      %407 = vector.extract_strided_slice %406 {offsets = [0, 0], sizes = [2, 32], strides = [1, 1]} : vector<2x128xf32> to vector<2x32xf32>
      %408 = vector.extract_strided_slice %406 {offsets = [0, 32], sizes = [2, 32], strides = [1, 1]} : vector<2x128xf32> to vector<2x32xf32>
      %409 = vector.extract_strided_slice %406 {offsets = [0, 64], sizes = [2, 32], strides = [1, 1]} : vector<2x128xf32> to vector<2x32xf32>
      %cst_188 = arith.constant 2.000000e+00 : f32
      %410 = vector.broadcast %cst_188 : f32 to vector<2x32xf32>
      %411 = arith.mulf %410, %409 : vector<2x32xf32>
      %cst_189 = arith.constant 1.000000e+00 : f32
      %412 = vector.broadcast %cst_189 : f32 to vector<2x32xf32>
      %413 = arith.subf %411, %412 : vector<2x32xf32>
      %414 = vector.extract_strided_slice %406 {offsets = [0, 96], sizes = [2, 32], strides = [1, 1]} : vector<2x128xf32> to vector<2x32xf32>
      %415 = arith.mulf %408, %386 : vector<2x32xf32>
      %416 = arith.mulf %407, %413 : vector<2x32xf32>
      %417 = arith.addf %415, %416 : vector<2x32xf32>
      %418 = math.tanh %417 : vector<2x32xf32>
      %419 = arith.mulf %414, %418 : vector<2x32xf32>
      %420 = tpu.concatenate %419, %417 in 1 : vector<2x32xf32>, vector<2x32xf32> -> vector<2x64xf32>
      scf.yield %98, %144, %190, %236, %282, %328, %374, %420 : vector<2x64xf32>, vector<2x64xf32>, vector<2x64xf32>, vector<2x64xf32>, vector<2x64xf32>, vector<2x64xf32>, vector<2x64xf32>, vector<2x64xf32>
    }
    %c3_i32_7 = arith.constant 3 : i32
    %10 = vector.extract_strided_slice %9#7 {offsets = [0, 0], sizes = [2, 32], strides = [1, 1]} : vector<2x64xf32> to vector<2x32xf32>
    %11 = arith.truncf %10 : vector<2x32xf32> to vector<2x32xbf16>
    %c0 = arith.constant 0 : index
    %c0_8 = arith.constant 0 : index
    %12 = vector.load %arg6[%c0, %c0_8] : memref<32x4xbf16, #tpu.memory_space<vmem>>, vector<32x4xbf16>
    %cst_9 = arith.constant dense<0.000000e+00> : vector<2x4xf32>
    %13 = tpu.matmul %11, %12, %cst_9 {dimension_numbers = #tpu.dot_dimension_numbers<[1], [0], [0], [1], [0, 0, 1, 1], [], []>} : vector<2x32xbf16>, vector<32x4xbf16>, vector<2x4xf32> -> vector<2x4xf32>
    %c0_10 = arith.constant 0 : index
    %c0_11 = arith.constant 0 : index
    %14 = vector.load %arg7[%c0_10, %c0_11] : memref<1x4xf32, #tpu.memory_space<vmem>>, vector<1x4xf32>
    %15 = vector.broadcast %14 : vector<1x4xf32> to vector<2x4xf32>
    %16 = arith.addf %13, %15 : vector<2x4xf32>
    %cst_12 = arith.constant 0.000000e+00 : f32
    %17 = vector.broadcast %cst_12 : f32 to vector<2x4xf32>
    %18 = arith.maximumf %16, %17 : vector<2x4xf32>
    %cst_13 = arith.constant dense<0.000000e+00> : vector<4xf32>
    %19 = vector.multi_reduction <add>, %18, %cst_13 [0] : vector<2x4xf32> to vector<4xf32>
    %20 = vector.shape_cast %19 : vector<4xf32> to vector<1x4xf32>
    %cst_14 = arith.constant 2.000000e+00 : f32
    %21 = vector.broadcast %cst_14 : f32 to vector<1x4xf32>
    %22 = arith.divf %20, %21 : vector<1x4xf32>
    %23 = vector.broadcast %22 : vector<1x4xf32> to vector<2x4xf32>
    %24 = arith.subf %18, %23 : vector<2x4xf32>
    %25 = arith.mulf %24, %24 : vector<2x4xf32>
    %cst_15 = arith.constant dense<0.000000e+00> : vector<4xf32>
    %26 = vector.multi_reduction <add>, %25, %cst_15 [0] : vector<2x4xf32> to vector<4xf32>
    %27 = vector.shape_cast %26 : vector<4xf32> to vector<1x4xf32>
    %cst_16 = arith.constant 2.000000e+00 : f32
    %28 = vector.broadcast %cst_16 : f32 to vector<1x4xf32>
    %29 = arith.divf %27, %28 : vector<1x4xf32>
    %c0_17 = arith.constant 0 : index
    %c0_18 = arith.constant 0 : index
    %30 = vector.load %arg8[%c0_17, %c0_18] : memref<1x4xf32, #tpu.memory_space<vmem>>, vector<1x4xf32>
    %31 = vector.broadcast %22 : vector<1x4xf32> to vector<2x4xf32>
    %32 = arith.subf %18, %31 : vector<2x4xf32>
    %33 = vector.broadcast %30 : vector<1x4xf32> to vector<2x4xf32>
    %34 = arith.mulf %33, %32 : vector<2x4xf32>
    %cst_19 = arith.constant 9.99999974E-6 : f32
    %35 = vector.broadcast %cst_19 : f32 to vector<1x4xf32>
    %36 = arith.addf %29, %35 : vector<1x4xf32>
    %37 = math.rsqrt %36 : vector<1x4xf32>
    %38 = vector.broadcast %37 : vector<1x4xf32> to vector<2x4xf32>
    %39 = arith.mulf %34, %38 : vector<2x4xf32>
    %c0_20 = arith.constant 0 : index
    %c0_21 = arith.constant 0 : index
    %40 = vector.load %arg9[%c0_20, %c0_21] : memref<1x4xf32, #tpu.memory_space<vmem>>, vector<1x4xf32>
    %41 = vector.broadcast %40 : vector<1x4xf32> to vector<2x4xf32>
    %42 = arith.addf %39, %41 : vector<2x4xf32>
    %43 = arith.negf %42 : vector<2x4xf32>
    %44 = math.exp %43 : vector<2x4xf32>
    %cst_22 = arith.constant 1.000000e+00 : f32
    %45 = vector.broadcast %cst_22 : f32 to vector<2x4xf32>
    %46 = arith.addf %45, %44 : vector<2x4xf32>
    %47 = arith.divf %45, %46 : vector<2x4xf32>
    %c0_23 = arith.constant 0 : index
    %c0_24 = arith.constant 0 : index
    %48 = vector.load %arg10[%c0_23, %c0_24] : memref<2x4xf32, #tpu.memory_space<vmem>>, vector<2x4xf32>
    tpu.vector_store %arg10[%c0_23, %c0_24], %47 {strides = array<i32>} : memref<2x4xf32, #tpu.memory_space<vmem>>, vector<2x4xf32>,
    %c0_25 = arith.constant 0 : index
    %c0_26 = arith.constant 0 : index
    %49 = vector.load %arg11[%c0_25, %c0_26] : memref<2x32xf32, #tpu.memory_space<vmem>>, vector<2x32xf32>
    tpu.vector_store %arg11[%c0_25, %c0_26], %10 {strides = array<i32>} : memref<2x32xf32, #tpu.memory_space<vmem>>, vector<2x32xf32>,
    return
  }
}

</mosaic_0001>

<bundles_post_ra>
// kernel: block_rnn_forward.1
= control target key start
LH: loop header
LB: loop body
LE: loop exit
PB: predicated region body
PF: predicated region fallthrough
CT: control target
= control target key end

     0   :  { %17 = vsyncpa [#allocation3], 0  ;;  %s4106_s0 = inlined_call_operand.vmem [shape: f32[3,2,8], index: 0, kind: input, shape index: {}]   ;;  %s4107_s1 = inlined_call_operand.vmem [shape: bf16[8,128,64], index: 1, kind: input, shape index: {}]   ;;  %s4108_s2 = inlined_call_operand.vmem [shape: f32[8,1,64], index: 2, kind: input, shape index: {}]   ;;  %s4109_s3 = inlined_call_operand.vmem [shape: bf16[8,64,128], index: 3, kind: input, shape index: {}]   ;;  %s4110_s4 = inlined_call_operand.vmem [shape: f32[8,1,128], index: 4, kind: input, shape index: {}]   ;;  %s4111_s5 = inlined_call_operand.vmem [shape: f32[8,1,128], index: 5, kind: input, shape index: {}]   ;;  %s4112_s6 = inlined_call_operand.vmem [shape: bf16[32,4], index: 6, kind: input, shape index: {}]   ;;  %s4113_s7 = inlined_call_operand.vmem [shape: f32[1,4], index: 7, kind: input, shape index: {}]   ;;  %s4114_s8 = inlined_call_operand.vmem [shape: f32[1,4], index: 8, kind: input, shape index: {}]   ;;  %s4115_s9 = inlined_call_operand.vmem [shape: f32[1,4], index: 9, kind: input, shape index: {}]   ;;  %s4116_s10 = inlined_call_operand.hbm [shape: f32[2,4], index: 10, kind: output, shape index: {0}]   ;;  %s4117_s11 = inlined_call_operand.hbm [shape: f32[2,32], index: 11, kind: output, shape index: {1}]  }
   0x1   :  { %18 = vsyncpa [#allocation5], 0  ;;  %v3397_v0 = vmov 0.0   ;;  %v3399_v1 = vmov 0.0   ;;  %v3401_v2 = vmov 0.0   ;;  %v3403_v3 = vmov 0.0  }
   0x2   :  { %v3405_v4 = vmov 0.0   ;;  %v3407_v5 = vmov 0.0   ;;  %v3409_v6 = vmov 0.0   ;;  %v3411_v7 = vmov 0.0   ;;  %s3413_s17 = smov 0  }
   0x3 LB: > { %v3321_v8 = vmov 0.0   ;;  %v3048_v9 = vld [vmem:[%s4107_s1] sm:$0xff]   ;;  %s3322_s20 = smov 64   ;;  %v3049_v10 = vld [vmem:[%s4107_s1 + $0x8] sm:$0xff]   ;;  %vm3323_vm0 = vmmov 0   ;;  %v3050_v11 = vld [vmem:[%s4107_s1 + $0x10] sm:$0xff]   ;;  %s3319_s17 = sphi %s3413_s17, %s45_s17   ;;  %v3315_v7 = vphi %v3411_v7, %v3568_v7   ;;  %v3311_v6 = vphi %v3409_v6, %v3642_v6   ;;  %v3307_v5 = vphi %v3407_v5, %v3716_v5   ;;  %v3303_v4 = vphi %v3405_v4, %v3790_v4   ;;  %v3299_v3 = vphi %v3403_v3, %v3864_v3   ;;  %v3295_v2 = vphi %v3401_v2, %v3938_v2   ;;  %v3291_v1 = vphi %v3399_v1, %v1804_v1   ;;  %v3287_v0 = vphi %v3397_v0, %v4118_v0  }
   0x4   : > { %2687 = vmatprep.subr.bf16.mxu0 %v3321_v8  ;;  %2707 = vmatprep.subr.bf16.mxu1 %v3321_v8  ;;  %v3056_v12 = vld [vmem:[%s4109_s3] sm:$0xff]   ;;  %v3051_v13 = vld [vmem:[%s4107_s1 + $0x18] sm:$0xff]   ;;  %v3057_v14 = vld [vmem:[%s4109_s3 + $0x8] sm:$0xff]   ;;  %vm61_vm1 = vcmask 523264   ;;  %v3324_v24 = vmov 0   ;;  %s2231_s26 = sshll.u32 %s3319_s17, 1 }
   0x5   : > { %58 = vrot.lane.b32.xlu0 %v3315_v7, %s3322_s20  ;;  %2688 = vmatpush3.bf16.msra.mxu0 %v3048_v9  ;;  %v3052_v15 = vld [vmem:[%s4107_s1 + $0x20] sm:$0xff]   ;;  %v3053_v16 = vld [vmem:[%s4107_s1 + $0x28] sm:$0xff]   ;;  %v3054_v17 = vld [vmem:[%s4107_s1 + $0x30] sm:$0xff]   ;;  %s3503_s29 = scalar_lea.vmem %s4106_s0, %s2231_s26  ;;  %s3325_s18 = smov 32   ;;  %vm303_vm2 = vcmask 261120  }
   0x6   : > { %2703 = vmatprep.mubr.msk.bf16.mxu0 %vm3323_vm0, %v3321_v8  ;;  %2689 = vmatprep.subr.bf16.mxu0 %v3321_v8  ;;  %v3055_v18 = vld [vmem:[%s4107_s1 + $0x38] sm:$0xff]   ;;  %v3058_v22 = vld [vmem:[%s4109_s3 + $0x10] sm:$0xff]   ;;  %v3506_v25 = vld [vmem:[%s3503_s29] sm:$0x3]  ;;  %s45_s17 = sadd.s32 1, %s3319_s17  }
   0x7   : > { %2715 = vmatprep.mubr.msk.bf16.mxu1 %vm3323_vm0, %v3321_v8  ;;  %2708 = vmatpush3.bf16.msra.mxu1 %v3056_v12  ;;  %v3059_v23 = vld [vmem:[%s4109_s3 + $0x18] sm:$0xff]   ;;  %v2232_v26 = vld [vmem:[%s4108_s2] ss:$0 sm:$0xff]  ;;  %v3061_v56 = vld [vmem:[%s4107_s1 + $0x48] sm:$0xff]   ;;  %p42_p0 = scmp.ge.s32.totalorder %s45_s17, 3  }
   0x8   : > { %2709 = vmatprep.subr.bf16.mxu1 %v3321_v8  ;;  %3039 = vset.pattern.permute.xlu0 %v3324_v24  ;;  %v2241_v34 = vld [vmem:[%s4110_s4] ss:$0 sm:$0xff]  ;;  %v3062_v57 = vld [vmem:[%s4107_s1 + $0x50] sm:$0xff]   ;;  %v3063_v59 = vld [vmem:[%s4107_s1 + $0x58] sm:$0xff]   ;;  %vm3334_vm3 = vmmov (%p42_p0), 0   ;;  %vm2170_vm4 = vcmask (%p42_p0), 254976  }
   0x9   : > { %2690 = vmatpush3.bf16.msra.mxu0 %v3049_v10  ;;  %179 = vperm.xlu0 %3039, %v3506_v25   ;;  %v2242_v37 = vld [vmem:[%s4111_s5] ss:$0 sm:$0xff]  ;;  %v3065_v61 = vld [vmem:[%s4107_s1 + $0x68] sm:$0xff]   ;;  %v3066_v62 = vld [vmem:[%s4107_s1 + $0x70] sm:$0xff]   ;;  %s3335_s17 = smov (%p42_p0), [#allocation4]  }
   0xa   : > { %2691 = vmatprep.subr.bf16.mxu0 %v3321_v8  ;;  %v3060_v55 = vld [vmem:[%s4107_s1 + $0x40] sm:$0xff]   ;;  %v3067_v63 = vld [vmem:[%s4107_s1 + $0x78] sm:$0xff]   ;;  %v3069_v7 = vld [vmem:[%s4109_s3 + $0x28] sm:$0xff]   ;;  %s2188_s0 = sshll.u32 (%p42_p0), %s3335_s17, 4  ;;  %s2189_s0 = int_to_ptr.vmem [resolvable:$true] %s2188_s0 }
   0xb   : > { %2710 = vmatpush3.bf16.msra.mxu1 %v3057_v14  ;;  %v3064_v60 = vld [vmem:[%s4107_s1 + $0x60] sm:$0xff]   ;;  %p3206_p2 = scmp.lt.s32.totalorder (%p42_p0), %s2189_s0, %s2189_s0 }
   0xc   : > { %2711 = vmatprep.subr.bf16.mxu1 %v3321_v8 }
   0xd   : > { %2692 = vmatpush3.bf16.msra.mxu0 %v3050_v11 }
   0xe   : > { %2693 = vmatprep.subr.bf16.mxu0 %v3321_v8 }
   0xf   : > { %2712 = vmatpush3.bf16.msra.mxu1 %v3058_v22 }
  0x10   : > { %2713 = vmatprep.subr.bf16.mxu1 %v3321_v8 }
  0x11   : > { %2694 = vmatpush3.bf16.msra.mxu0 %v3051_v13 }
  0x12   : > { %2695 = vmatprep.subr.bf16.mxu0 %v3321_v8 }
  0x13   : > { %2714 = vmatpush3.bf16.msra.mxu1 %v3059_v23 }
  0x14   : > { %2719 = vmatprep.subr.bf16.mxu1 %v3321_v8 }
  0x15   : > { %2696 = vmatpush3.bf16.msra.mxu0 %v3052_v15  ;;  %v3070_v15 = vld [vmem:[%s4109_s3 + $0x30] sm:$0xff]  }
  0x16   : > { %2697 = vmatprep.subr.bf16.mxu0 %v3321_v8 }
  0x19   : > { %2698 = vmatpush3.bf16.msra.mxu0 %v3053_v16  ;;  %v3071_v16 = vld [vmem:[%s4109_s3 + $0x38] sm:$0xff]  }
  0x1a   : > { %2699 = vmatprep.subr.bf16.mxu0 %v3321_v8 }
  0x1d   : > { %2700 = vmatpush3.bf16.msra.mxu0 %v3054_v17  ;;  %v3326_v17 = vmov 1  }
  0x1e   : > { %2701 = vmatprep.subr.bf16.mxu0 %v3321_v8  ;;  %3040 = vset.pattern.permute.xlu0 %v3326_v17 }
  0x21   : > { %2702 = vmatpush3.bf16.msra.mxu0 %v3055_v18  ;;  %v2267_v18 = vld [vmem:[%s4108_s2 + $0x1] ss:$0 sm:$0xff] }
  0x22   : > { %2739 = vmatprep.subr.bf16.mxu0 %v3321_v8 }
  0x77   : > { %v59_v19 = vpop.permute.xlu0 %58 }
  0x78   : > { %v62_v20 = vsel %vm61_vm1, %v3287_v0, %v59_v19 }
  0x79   : > { %v63_v21 = vpack.c.bf16 %v62_v20, %v62_v20 }
  0x7b   : > { %2704 = vmatmul.mubr.bf16.vlgmr.msra.gmra.mrb[0].mxu0 %v63_v21 }
  0x7c   : > { %2747 = vmatprep.mubr.msk.bf16.mxu0 %vm3323_vm0, %v3321_v8 }
  0x88   : > { %v180_v35 = vpop.permute.xlu0 %179 }
  0x89   : > { %v188_v36 = vmul.f32 %v2241_v34, %v180_v35 }
  0x8b   : > { %v196_v38 = vadd.f32 %v2242_v37, %v188_v36 }
 0x14e   : > { %v169_v27 = vpop.f32.mrb[0].mxu0 }
 0x14f   : > { %v170_v28 = vadd.f32 %v2232_v26, %v169_v27  ;;  %v2705_v29 = vpop.f32.mrb[1].mxu0  ;;  %v2277_v27 = vld [vmem:[%s4110_s4 + $0x1] ss:$0 sm:$0xff] }
 0x150   : > { %v172_v30 = vpop.f32.mrb[2].mxu0 }
 0x151   : > { %v175_v31 = vmax.f32 %v170_v28, 0.0  ;;  %v2706_v32 = vpop.f32.mrb[3].mxu0  ;;  %v2279_v30 = vld [vmem:[%s4111_s5 + $0x1] ss:$0 sm:$0xff] }
 0x153   : > { %v197_v33 = vpack.c.bf16 %v175_v31, %v175_v31 }
 0x155   : > { %2716 = vmatmul.mubr.msk.bf16.vlgmr.msra.gmra.mrb[0].mxu1 %vm61_vm1, %v197_v33 }
 0x156   : > { %2735 = vmatprep.mubr.msk.bf16.mxu1 %vm3323_vm0, %v3321_v8  ;;  %2720 = vmatpush3.bf16.msra.mxu1 %v3060_v55  ;;  %v3078_v55 = vld [vmem:[%s4107_s1 + $0xb0] sm:$0xff]  }
 0x157   : > { %2721 = vmatprep.subr.bf16.mxu1 %v3321_v8 }
 0x15a   : > { %2722 = vmatpush3.bf16.msra.mxu1 %v3061_v56  ;;  %v3080_v56 = vld [vmem:[%s4109_s3 + $0x40] sm:$0xff]  }
 0x15b   : > { %2723 = vmatprep.subr.bf16.mxu1 %v3321_v8 }
 0x15e   : > { %2724 = vmatpush3.bf16.msra.mxu1 %v3062_v57  ;;  %v3081_v57 = vld [vmem:[%s4109_s3 + $0x48] sm:$0xff]  }
 0x15f   : > { %2725 = vmatprep.subr.bf16.mxu1 %v3321_v8 }
 0x162   : > { %2726 = vmatpush3.bf16.msra.mxu1 %v3063_v59 }
 0x163   : > { %2727 = vmatprep.subr.bf16.mxu1 %v3321_v8 }
 0x166   : > { %2728 = vmatpush3.bf16.msra.mxu1 %v3064_v60 }
 0x167   : > { %2729 = vmatprep.subr.bf16.mxu1 %v3321_v8 }
 0x16a   : > { %2730 = vmatpush3.bf16.msra.mxu1 %v3065_v61 }
 0x16b   : > { %2731 = vmatprep.subr.bf16.mxu1 %v3321_v8 }
 0x16e   : > { %2732 = vmatpush3.bf16.msra.mxu1 %v3066_v62 }
 0x16f   : > { %2733 = vmatprep.subr.bf16.mxu1 %v3321_v8 }
 0x172   : > { %2734 = vmatpush3.bf16.msra.mxu1 %v3067_v63 }
 0x173   : > { %2771 = vmatprep.subr.bf16.mxu1 %v3321_v8 }
 0x228   : > { %v267_v39 = vpop.f32.mrb[0].mxu1 }
 0x229   : > { %v273_v40 = vadd.f32 %v267_v39, %v196_v38  ;;  %v2717_v41 = vpop.f32.mrb[1].mxu1 }
 0x22a   : > { %v270_v42 = vpop.f32.mrb[2].mxu1 }
 0x22b   : > { %v2248_v43 = vmul.f32 -1.442695, %v273_v40  ;;  %v2718_v44 = vpop.f32.mrb[3].mxu1 }
 0x22d   : > { %3144 = vpow2.f32 %v2248_v43 }
 0x237   : > { %v3145_v45 = vpop.eup %3144 }
 0x238   : > { %v277_v46 = vadd.f32 1.0, %v3145_v45 }
 0x23a   : > { %3146 = vrcp.f32 %v277_v46 }
 0x244   : > { %v3147_v47 = vpop.eup %3146 }
 0x245   : > { %v280_v48 = vmul.f32 2.0, %v3147_v47  ;;  %v282_v52 = vmul.f32 %v3147_v47, %v175_v31 }
 0x247   : > { %v2249_v49 = vadd.f32 -1.0, %v280_v48  ;;  %v3072_v48 = vld [vmem:[%s4107_s1 + $0x80] sm:$0xff]  }
 0x249   : > { %284 = vrot.lane.b32.xlu1 %v2249_v49, %s3322_s20  ;;  %v3073_v49 = vld [vmem:[%s4107_s1 + $0x88] sm:$0xff]  }
 0x2bb   : > { %v285_v50 = vpop.permute.xlu1 %284 }
 0x2bc   : > { %v287_v51 = vmul.f32 %v3147_v47, %v285_v50  ;;  %v3074_v50 = vld [vmem:[%s4107_s1 + $0x90] sm:$0xff]  }
 0x2be   : > { %289 = vrot.lane.b32.xlu1 %v287_v51, %s3325_s18 }
 0x330   : > { %v290_v53 = vpop.permute.xlu1 %289 }
 0x331   : > { %v292_v54 = vadd.f32 %v290_v53, %v282_v52  ;;  %v3075_v52 = vld [vmem:[%s4107_s1 + $0x98] sm:$0xff]   ;;  %v3076_v53 = vld [vmem:[%s4107_s1 + $0xa0] sm:$0xff]  }
 0x333   : > { %3148 = vtanh.f32 %v292_v54 }
 0x33d   : > { %v3149_v58 = vpop.eup %3148 }
 0x33e   : > { %295 = vrot.lane.b32.xlu1 %v3149_v58, %s3322_s20 }
 0x342   : > { %306 = vrot.lane.b32.xlu1 %v3311_v6, %s3322_s20  ;;  %v3068_v6 = vld [vmem:[%s4109_s3 + $0x20] sm:$0xff]  }
 0x343   : > { %2740 = vmatpush3.bf16.msra.mxu0 %v3068_v6 }
 0x344   : > { %2741 = vmatprep.subr.bf16.mxu0 %v3321_v8 }
 0x347   : > { %2742 = vmatpush3.bf16.msra.mxu0 %v3069_v7 }
 0x348   : > { %2743 = vmatprep.subr.bf16.mxu0 %v3321_v8 }
 0x34b   : > { %2744 = vmatpush3.bf16.msra.mxu0 %v3070_v15 }
 0x34c   : > { %2745 = vmatprep.subr.bf16.mxu0 %v3321_v8 }
 0x34f   : > { %2746 = vmatpush3.bf16.msra.mxu0 %v3071_v16 }
 0x350   : > { %2751 = vmatprep.subr.bf16.mxu0 %v3321_v8 }
 0x3b0   : > { %v296_v9 = vpop.permute.xlu1 %295 }
 0x3b1   : > { %v298_v10 = vmul.f32 %v3147_v47, %v296_v9  ;;  %v3082_v9 = vld [vmem:[%s4109_s3 + $0x50] sm:$0xff]  }
 0x3b3   : > { %300 = vrot.lane.b32.xlu0 %v298_v10, %s3325_s18  ;;  %v3083_v10 = vld [vmem:[%s4109_s3 + $0x58] sm:$0xff]  }
 0x3b4   : > { %v307_v11 = vpop.permute.xlu1 %306 }
 0x3b7   : > { %428 = vperm.xlu0 %3040, %v3506_v25  }
 0x425   : > { %v301_v12 = vpop.permute.xlu0 %300 }
 0x426   : > { %v3568_v7 = vsel %vm303_vm2, %v301_v12, %v292_v54   ;;  %v3077_v54 = vld [vmem:[%s4107_s1 + $0xa8] sm:$0xff]   ;;  %v2312_v12 = vld [vmem:[%s4108_s2 + $0x2] ss:$0 sm:$0xff] }
 0x427   : > { %v309_v13 = vsel %vm61_vm1, %v3568_v7, %v307_v11  ;;  %v3327_v11 = vmov 2  }
 0x428   : > { %v310_v14 = vpack.c.bf16 %v309_v13, %v309_v13  ;;  %3041 = vset.pattern.permute.xlu1 %v3327_v11 }
 0x42a   : > { %2736 = vmatmul.mubr.bf16.vlgmr.msra.gmra.mrb[4].mxu1 %v310_v14 }
 0x42b   : > { %2779 = vmatprep.mubr.msk.bf16.mxu1 %vm3323_vm0, %v3321_v8  ;;  %2772 = vmatpush3.bf16.msra.mxu1 %v3080_v56 }
 0x42c   : > { %2773 = vmatprep.subr.bf16.mxu1 %v3321_v8 }
 0x42f   : > { %2774 = vmatpush3.bf16.msra.mxu1 %v3081_v57 }
 0x430   : > { %2775 = vmatprep.subr.bf16.mxu1 %v3321_v8 }
 0x433   : > { %2776 = vmatpush3.bf16.msra.mxu1 %v3082_v9 }
 0x434   : > { %2777 = vmatprep.subr.bf16.mxu1 %v3321_v8 }
 0x436   : > { %v429_v28 = vpop.permute.xlu0 %428 }
 0x437   : > { %v437_v29 = vmul.f32 %v2277_v27, %v429_v28  ;;  %2778 = vmatpush3.bf16.msra.mxu1 %v3083_v10 }
 0x438   : > { %2783 = vmatprep.subr.bf16.mxu1 %v3321_v8 }
 0x439   : > { %v446_v31 = vadd.f32 %v2279_v30, %v437_v29 }
 0x4fd   : > { %v418_v19 = vpop.f32.mrb[4].mxu1 }
 0x4fe   : > { %v419_v20 = vadd.f32 %v2267_v18, %v418_v19  ;;  %v2737_v21 = vpop.f32.mrb[5].mxu1 }
 0x4ff   : > { %v421_v22 = vpop.f32.mrb[6].mxu1 }
 0x500   : > { %v424_v23 = vmax.f32 %v419_v20, 0.0  ;;  %v2738_v24 = vpop.f32.mrb[7].mxu1  ;;  %v2322_v20 = vld [vmem:[%s4110_s4 + $0x2] ss:$0 sm:$0xff] }
 0x502   : > { %v447_v26 = vpack.c.bf16 %v424_v23, %v424_v23 }
 0x504   : > { %2748 = vmatmul.mubr.msk.bf16.vlgmr.msra.gmra.mrb[4].mxu0 %vm61_vm1, %v447_v26 }
 0x505   : > { %2767 = vmatprep.mubr.msk.bf16.mxu0 %vm3323_vm0, %v3321_v8  ;;  %2752 = vmatpush3.bf16.msra.mxu0 %v3072_v48  ;;  %v3089_v48 = vld [vmem:[%s4107_s1 + $0xe8] sm:$0xff]  }
 0x506   : > { %2753 = vmatprep.subr.bf16.mxu0 %v3321_v8 }
 0x509   : > { %2754 = vmatpush3.bf16.msra.mxu0 %v3073_v49  ;;  %v3090_v49 = vld [vmem:[%s4107_s1 + $0xf0] sm:$0xff]  }
 0x50a   : > { %2755 = vmatprep.subr.bf16.mxu0 %v3321_v8 }
 0x50d   : > { %2756 = vmatpush3.bf16.msra.mxu0 %v3074_v50  ;;  %v3092_v50 = vld [vmem:[%s4109_s3 + $0x60] sm:$0xff]  }
 0x50e   : > { %2757 = vmatprep.subr.bf16.mxu0 %v3321_v8 }
 0x511   : > { %2758 = vmatpush3.bf16.msra.mxu0 %v3075_v52 }
 0x512   : > { %2759 = vmatprep.subr.bf16.mxu0 %v3321_v8 }
 0x515   : > { %2760 = vmatpush3.bf16.msra.mxu0 %v3076_v53 }
 0x516   : > { %2761 = vmatprep.subr.bf16.mxu0 %v3321_v8 }
 0x519   : > { %2762 = vmatpush3.bf16.msra.mxu0 %v3077_v54 }
 0x51a   : > { %2763 = vmatprep.subr.bf16.mxu0 %v3321_v8 }
 0x51d   : > { %2764 = vmatpush3.bf16.msra.mxu0 %v3078_v55 }
 0x51e   : > { %2765 = vmatprep.subr.bf16.mxu0 %v3321_v8 }
 0x5d7   : > { %v518_v32 = vpop.f32.mrb[4].mxu0 }
 0x5d8   : > { %v524_v33 = vadd.f32 %v518_v32, %v446_v31  ;;  %v2749_v34 = vpop.f32.mrb[5].mxu0 }
 0x5d9   : > { %v521_v35 = vpop.f32.mrb[6].mxu0 }
 0x5da   : > { %v2293_v36 = vmul.f32 -1.442695, %v524_v33  ;;  %v2750_v37 = vpop.f32.mrb[7].mxu0 }
 0x5dc   : > { %3150 = vpow2.f32 %v2293_v36 }
 0x5e6   : > { %v3151_v38 = vpop.eup %3150 }
 0x5e7   : > { %v528_v39 = vadd.f32 1.0, %v3151_v38 }
 0x5e9   : > { %3152 = vrcp.f32 %v528_v39 }
 0x5f3   : > { %v3153_v40 = vpop.eup %3152 }
 0x5f4   : > { %v531_v41 = vmul.f32 2.0, %v3153_v40  ;;  %v533_v45 = vmul.f32 %v3153_v40, %v424_v23  ;;  %v2324_v23 = vld [vmem:[%s4111_s5 + $0x2] ss:$0 sm:$0xff] }
 0x5f6   : > { %v2294_v42 = vadd.f32 -1.0, %v531_v41 }
 0x5f8   : > { %535 = vrot.lane.b32.xlu1 %v2294_v42, %s3322_s20  ;;  %v3084_v42 = vld [vmem:[%s4107_s1 + $0xc0] sm:$0xff]  }
 0x66a   : > { %v536_v43 = vpop.permute.xlu1 %535 }
 0x66b   : > { %v538_v44 = vmul.f32 %v3153_v40, %v536_v43  ;;  %v3085_v43 = vld [vmem:[%s4107_s1 + $0xc8] sm:$0xff]  }
 0x66d   : > { %540 = vrot.lane.b32.xlu1 %v538_v44, %s3325_s18  ;;  %v3086_v44 = vld [vmem:[%s4107_s1 + $0xd0] sm:$0xff]  }
 0x6df   : > { %v541_v46 = vpop.permute.xlu1 %540 }
 0x6e0   : > { %v543_v47 = vadd.f32 %v541_v46, %v533_v45  ;;  %v3087_v46 = vld [vmem:[%s4107_s1 + $0xd8] sm:$0xff]  }
 0x6e2   : > { %3154 = vtanh.f32 %v543_v47 }
 0x6ec   : > { %v3155_v51 = vpop.eup %3154 }
 0x6ed   : > { %546 = vrot.lane.b32.xlu0 %v3155_v51, %s3322_s20  ;;  %v3093_v51 = vld [vmem:[%s4109_s3 + $0x68] sm:$0xff]  }
 0x6f1   : > { %556 = vrot.lane.b32.xlu0 %v3307_v5, %s3322_s20  ;;  %v3079_v5 = vld [vmem:[%s4107_s1 + $0xb8] sm:$0xff]  }
 0x6f2   : > { %2766 = vmatpush3.bf16.msra.mxu0 %v3079_v5 }
 0x6f3   : > { %2803 = vmatprep.subr.bf16.mxu0 %v3321_v8 }
 0x75f   : > { %v547_v58 = vpop.permute.xlu0 %546 }
 0x760   : > { %v549_v59 = vmul.f32 %v3153_v40, %v547_v58  ;;  %v3094_v58 = vld [vmem:[%s4109_s3 + $0x70] sm:$0xff]  }
 0x762   : > { %551 = vrot.lane.b32.xlu1 %v549_v59, %s3325_s18  ;;  %v3095_v59 = vld [vmem:[%s4109_s3 + $0x78] sm:$0xff]  }
 0x763   : > { %v557_v60 = vpop.permute.xlu0 %556 }
 0x766   : > { %678 = vperm.xlu1 %3041, %v3506_v25  }
 0x7d4   : > { %v552_v61 = vpop.permute.xlu1 %551 }
 0x7d5   : > { %v3642_v6 = vsel %vm303_vm2, %v552_v61, %v543_v47   ;;  %v3088_v47 = vld [vmem:[%s4107_s1 + $0xe0] sm:$0xff]  }
 0x7d6   : > { %v559_v62 = vsel %vm61_vm1, %v3642_v6, %v557_v60  ;;  %v3328_v60 = vmov 3   ;;  %v2357_v61 = vld [vmem:[%s4108_s2 + $0x3] ss:$0 sm:$0xff] }
 0x7d7   : > { %v560_v63 = vpack.c.bf16 %v559_v62, %v559_v62  ;;  %3042 = vset.pattern.permute.xlu1 %v3328_v60 }
 0x7d9   : > { %2768 = vmatmul.mubr.bf16.vlgmr.msra.gmra.mrb[8].mxu0 %v560_v63 }
 0x7da   : > { %2811 = vmatprep.mubr.msk.bf16.mxu0 %vm3323_vm0, %v3321_v8  ;;  %2804 = vmatpush3.bf16.msra.mxu0 %v3092_v50 }
 0x7db   : > { %2805 = vmatprep.subr.bf16.mxu0 %v3321_v8 }
 0x7de   : > { %2806 = vmatpush3.bf16.msra.mxu0 %v3093_v51 }
 0x7df   : > { %2807 = vmatprep.subr.bf16.mxu0 %v3321_v8 }
 0x7e2   : > { %2808 = vmatpush3.bf16.msra.mxu0 %v3094_v58 }
 0x7e3   : > { %2809 = vmatprep.subr.bf16.mxu0 %v3321_v8 }
 0x7e5   : > { %v679_v21 = vpop.permute.xlu1 %678 }
 0x7e6   : > { %v687_v22 = vmul.f32 %v2322_v20, %v679_v21  ;;  %2810 = vmatpush3.bf16.msra.mxu0 %v3095_v59 }
 0x7e7   : > { %2815 = vmatprep.subr.bf16.mxu0 %v3321_v8 }
 0x7e8   : > { %v696_v24 = vadd.f32 %v2324_v23, %v687_v22 }
 0x8ac   : > { %v668_v13 = vpop.f32.mrb[8].mxu0 }
 0x8ad   : > { %v669_v14 = vadd.f32 %v2312_v12, %v668_v13  ;;  %v2769_v15 = vpop.f32.mrb[9].mxu0 }
 0x8ae   : > { %v671_v16 = vpop.f32.mrb[10].mxu0 }
 0x8af   : > { %v674_v17 = vmax.f32 %v669_v14, 0.0  ;;  %v2770_v18 = vpop.f32.mrb[11].mxu0  ;;  %v2367_v14 = vld [vmem:[%s4110_s4 + $0x3] ss:$0 sm:$0xff] }
 0x8b1   : > { %v697_v19 = vpack.c.bf16 %v674_v17, %v674_v17 }
 0x8b3   : > { %2780 = vmatmul.mubr.msk.bf16.vlgmr.msra.gmra.mrb[8].mxu1 %vm61_vm1, %v697_v19 }
 0x8b4   : > { %2799 = vmatprep.mubr.msk.bf16.mxu1 %vm3323_vm0, %v3321_v8  ;;  %2784 = vmatpush3.bf16.msra.mxu1 %v3084_v42  ;;  %v3101_v42 = vld [vmem:[%s4107_s1 + $0x128] sm:$0xff]  }
 0x8b5   : > { %2785 = vmatprep.subr.bf16.mxu1 %v3321_v8 }
 0x8b8   : > { %2786 = vmatpush3.bf16.msra.mxu1 %v3085_v43  ;;  %v3102_v43 = vld [vmem:[%s4107_s1 + $0x130] sm:$0xff]  }
 0x8b9   : > { %2787 = vmatprep.subr.bf16.mxu1 %v3321_v8 }
 0x8bc   : > { %2788 = vmatpush3.bf16.msra.mxu1 %v3086_v44  ;;  %v3104_v44 = vld [vmem:[%s4109_s3 + $0x80] sm:$0xff]  }
 0x8bd   : > { %2789 = vmatprep.subr.bf16.mxu1 %v3321_v8 }
 0x8c0   : > { %2790 = vmatpush3.bf16.msra.mxu1 %v3087_v46 }
 0x8c1   : > { %2791 = vmatprep.subr.bf16.mxu1 %v3321_v8 }
 0x8c4   : > { %2792 = vmatpush3.bf16.msra.mxu1 %v3088_v47 }
 0x8c5   : > { %2793 = vmatprep.subr.bf16.mxu1 %v3321_v8 }
 0x8c8   : > { %2794 = vmatpush3.bf16.msra.mxu1 %v3089_v48 }
 0x8c9   : > { %2795 = vmatprep.subr.bf16.mxu1 %v3321_v8 }
 0x8cc   : > { %2796 = vmatpush3.bf16.msra.mxu1 %v3090_v49 }
 0x8cd   : > { %2797 = vmatprep.subr.bf16.mxu1 %v3321_v8 }
 0x986   : > { %v768_v26 = vpop.f32.mrb[8].mxu1 }
 0x987   : > { %v774_v27 = vadd.f32 %v768_v26, %v696_v24  ;;  %v2781_v28 = vpop.f32.mrb[9].mxu1 }
 0x988   : > { %v771_v29 = vpop.f32.mrb[10].mxu1 }
 0x989   : > { %v2338_v30 = vmul.f32 -1.442695, %v774_v27  ;;  %v2782_v31 = vpop.f32.mrb[11].mxu1 }
 0x98b   : > { %3156 = vpow2.f32 %v2338_v30 }
 0x995   : > { %v3157_v32 = vpop.eup %3156 }
 0x996   : > { %v778_v33 = vadd.f32 1.0, %v3157_v32 }
 0x998   : > { %3158 = vrcp.f32 %v778_v33 }
 0x9a2   : > { %v3159_v34 = vpop.eup %3158 }
 0x9a3   : > { %v781_v35 = vmul.f32 2.0, %v3159_v34  ;;  %v783_v39 = vmul.f32 %v3159_v34, %v674_v17  ;;  %v2369_v17 = vld [vmem:[%s4111_s5 + $0x3] ss:$0 sm:$0xff] }
 0x9a5   : > { %v2339_v36 = vadd.f32 -1.0, %v781_v35 }
 0x9a7   : > { %785 = vrot.lane.b32.xlu0 %v2339_v36, %s3322_s20  ;;  %v3096_v36 = vld [vmem:[%s4107_s1 + $0x100] sm:$0xff]  }
 0xa19   : > { %v786_v37 = vpop.permute.xlu0 %785 }
 0xa1a   : > { %v788_v38 = vmul.f32 %v3159_v34, %v786_v37  ;;  %v3097_v37 = vld [vmem:[%s4107_s1 + $0x108] sm:$0xff]  }
 0xa1c   : > { %790 = vrot.lane.b32.xlu1 %v788_v38, %s3325_s18  ;;  %v3098_v38 = vld [vmem:[%s4107_s1 + $0x110] sm:$0xff]  }
 0xa8e   : > { %v791_v40 = vpop.permute.xlu1 %790 }
 0xa8f   : > { %v793_v41 = vadd.f32 %v791_v40, %v783_v39  ;;  %v3099_v40 = vld [vmem:[%s4107_s1 + $0x118] sm:$0xff]  }
 0xa91   : > { %3160 = vtanh.f32 %v793_v41 }
 0xa9b   : > { %v3161_v45 = vpop.eup %3160 }
 0xa9c   : > { %796 = vrot.lane.b32.xlu0 %v3161_v45, %s3322_s20  ;;  %v3105_v45 = vld [vmem:[%s4109_s3 + $0x88] sm:$0xff]  }
 0xaa0   : > { %806 = vrot.lane.b32.xlu0 %v3303_v4, %s3322_s20  ;;  %v3091_v4 = vld [vmem:[%s4107_s1 + $0xf8] sm:$0xff]  }
 0xaa1   : > { %2798 = vmatpush3.bf16.msra.mxu1 %v3091_v4 }
 0xaa2   : > { %2835 = vmatprep.subr.bf16.mxu1 %v3321_v8 }
 0xb0e   : > { %v797_v52 = vpop.permute.xlu0 %796 }
 0xb0f   : > { %v799_v53 = vmul.f32 %v3159_v34, %v797_v52  ;;  %v3106_v52 = vld [vmem:[%s4109_s3 + $0x90] sm:$0xff]  }
 0xb11   : > { %801 = vrot.lane.b32.xlu1 %v799_v53, %s3325_s18  ;;  %v3107_v53 = vld [vmem:[%s4109_s3 + $0x98] sm:$0xff]  }
 0xb12   : > { %v807_v54 = vpop.permute.xlu0 %806 }
 0xb15   : > { %928 = vperm.xlu1 %3042, %v3506_v25  }
 0xb83   : > { %v802_v55 = vpop.permute.xlu1 %801 }
 0xb84   : > { %v3716_v5 = vsel %vm303_vm2, %v802_v55, %v793_v41   ;;  %v3100_v41 = vld [vmem:[%s4107_s1 + $0x120] sm:$0xff]  }
 0xb85   : > { %v809_v56 = vsel %vm61_vm1, %v3716_v5, %v807_v54  ;;  %v3329_v54 = vmov 4   ;;  %v2402_v55 = vld [vmem:[%s4108_s2 + $0x4] ss:$0 sm:$0xff] }
 0xb86   : > { %v810_v57 = vpack.c.bf16 %v809_v56, %v809_v56  ;;  %3043 = vset.pattern.permute.xlu1 %v3329_v54 }
 0xb88   : > { %2800 = vmatmul.mubr.bf16.vlgmr.msra.gmra.mrb[12].mxu1 %v810_v57 }
 0xb89   : > { %2843 = vmatprep.mubr.msk.bf16.mxu1 %vm3323_vm0, %v3321_v8  ;;  %2836 = vmatpush3.bf16.msra.mxu1 %v3104_v44 }
 0xb8a   : > { %2837 = vmatprep.subr.bf16.mxu1 %v3321_v8 }
 0xb8d   : > { %2838 = vmatpush3.bf16.msra.mxu1 %v3105_v45 }
 0xb8e   : > { %2839 = vmatprep.subr.bf16.mxu1 %v3321_v8 }
 0xb91   : > { %2840 = vmatpush3.bf16.msra.mxu1 %v3106_v52 }
 0xb92   : > { %2841 = vmatprep.subr.bf16.mxu1 %v3321_v8 }
 0xb94   : > { %v929_v15 = vpop.permute.xlu1 %928 }
 0xb95   : > { %v937_v16 = vmul.f32 %v2367_v14, %v929_v15  ;;  %2842 = vmatpush3.bf16.msra.mxu1 %v3107_v53 }
 0xb96   : > { %2847 = vmatprep.subr.bf16.mxu1 %v3321_v8 }
 0xb97   : > { %v946_v18 = vadd.f32 %v2369_v17, %v937_v16 }
 0xc5b   : > { %v918_v62 = vpop.f32.mrb[12].mxu1 }
 0xc5c   : > { %v919_v63 = vadd.f32 %v2357_v61, %v918_v62  ;;  %v2801_v9 = vpop.f32.mrb[13].mxu1 }
 0xc5d   : > { %v921_v10 = vpop.f32.mrb[14].mxu1 }
 0xc5e   : > { %v924_v11 = vmax.f32 %v919_v63, 0.0  ;;  %v2802_v12 = vpop.f32.mrb[15].mxu1  ;;  %v2412_v63 = vld [vmem:[%s4110_s4 + $0x4] ss:$0 sm:$0xff] }
 0xc60   : > { %v947_v13 = vpack.c.bf16 %v924_v11, %v924_v11 }
 0xc62   : > { %2812 = vmatmul.mubr.msk.bf16.vlgmr.msra.gmra.mrb[12].mxu0 %vm61_vm1, %v947_v13 }
 0xc63   : > { %2831 = vmatprep.mubr.msk.bf16.mxu0 %vm3323_vm0, %v3321_v8  ;;  %2816 = vmatpush3.bf16.msra.mxu0 %v3096_v36  ;;  %v3113_v36 = vld [vmem:[%s4107_s1 + $0x168] sm:$0xff]  }
 0xc64   : > { %2817 = vmatprep.subr.bf16.mxu0 %v3321_v8 }
 0xc67   : > { %2818 = vmatpush3.bf16.msra.mxu0 %v3097_v37  ;;  %v3114_v37 = vld [vmem:[%s4107_s1 + $0x170] sm:$0xff]  }
 0xc68   : > { %2819 = vmatprep.subr.bf16.mxu0 %v3321_v8 }
 0xc6b   : > { %2820 = vmatpush3.bf16.msra.mxu0 %v3098_v38  ;;  %v3116_v38 = vld [vmem:[%s4109_s3 + $0xa0] sm:$0xff]  }
 0xc6c   : > { %2821 = vmatprep.subr.bf16.mxu0 %v3321_v8 }
 0xc6f   : > { %2822 = vmatpush3.bf16.msra.mxu0 %v3099_v40 }
 0xc70   : > { %2823 = vmatprep.subr.bf16.mxu0 %v3321_v8 }
 0xc73   : > { %2824 = vmatpush3.bf16.msra.mxu0 %v3100_v41 }
 0xc74   : > { %2825 = vmatprep.subr.bf16.mxu0 %v3321_v8 }
 0xc77   : > { %2826 = vmatpush3.bf16.msra.mxu0 %v3101_v42 }
 0xc78   : > { %2827 = vmatprep.subr.bf16.mxu0 %v3321_v8 }
 0xc7b   : > { %2828 = vmatpush3.bf16.msra.mxu0 %v3102_v43 }
 0xc7c   : > { %2829 = vmatprep.subr.bf16.mxu0 %v3321_v8 }
 0xd35   : > { %v1018_v19 = vpop.f32.mrb[12].mxu0 }
 0xd36   : > { %v1024_v20 = vadd.f32 %v1018_v19, %v946_v18  ;;  %v2813_v21 = vpop.f32.mrb[13].mxu0 }
 0xd37   : > { %v1021_v22 = vpop.f32.mrb[14].mxu0 }
 0xd38   : > { %v2383_v23 = vmul.f32 -1.442695, %v1024_v20  ;;  %v2814_v24 = vpop.f32.mrb[15].mxu0 }
 0xd3a   : > { %3162 = vpow2.f32 %v2383_v23 }
 0xd44   : > { %v3163_v26 = vpop.eup %3162 }
 0xd45   : > { %v1028_v27 = vadd.f32 1.0, %v3163_v26 }
 0xd47   : > { %3164 = vrcp.f32 %v1028_v27 }
 0xd51   : > { %v3165_v28 = vpop.eup %3164 }
 0xd52   : > { %v1031_v29 = vmul.f32 2.0, %v3165_v28  ;;  %v1033_v33 = vmul.f32 %v3165_v28, %v924_v11  ;;  %v2414_v11 = vld [vmem:[%s4111_s5 + $0x4] ss:$0 sm:$0xff] }
 0xd54   : > { %v2384_v30 = vadd.f32 -1.0, %v1031_v29 }
 0xd56   : > { %1035 = vrot.lane.b32.xlu0 %v2384_v30, %s3322_s20  ;;  %v3108_v30 = vld [vmem:[%s4107_s1 + $0x140] sm:$0xff]  }
 0xdc8   : > { %v1036_v31 = vpop.permute.xlu0 %1035 }
 0xdc9   : > { %v1038_v32 = vmul.f32 %v3165_v28, %v1036_v31  ;;  %v3109_v31 = vld [vmem:[%s4107_s1 + $0x148] sm:$0xff]  }
 0xdcb   : > { %1040 = vrot.lane.b32.xlu1 %v1038_v32, %s3325_s18  ;;  %v3110_v32 = vld [vmem:[%s4107_s1 + $0x150] sm:$0xff]  }
 0xe3d   : > { %v1041_v34 = vpop.permute.xlu1 %1040 }
 0xe3e   : > { %v1043_v35 = vadd.f32 %v1041_v34, %v1033_v33  ;;  %v3111_v34 = vld [vmem:[%s4107_s1 + $0x158] sm:$0xff]  }
 0xe40   : > { %3166 = vtanh.f32 %v1043_v35 }
 0xe4a   : > { %v3167_v39 = vpop.eup %3166 }
 0xe4b   : > { %1046 = vrot.lane.b32.xlu0 %v3167_v39, %s3322_s20  ;;  %v3117_v39 = vld [vmem:[%s4109_s3 + $0xa8] sm:$0xff]  }
 0xe4f   : > { %1056 = vrot.lane.b32.xlu0 %v3299_v3, %s3322_s20  ;;  %v3103_v3 = vld [vmem:[%s4107_s1 + $0x138] sm:$0xff]  }
 0xe50   : > { %2830 = vmatpush3.bf16.msra.mxu0 %v3103_v3 }
 0xe51   : > { %2867 = vmatprep.subr.bf16.mxu0 %v3321_v8 }
 0xebd   : > { %v1047_v46 = vpop.permute.xlu0 %1046 }
 0xebe   : > { %v1049_v47 = vmul.f32 %v3165_v28, %v1047_v46  ;;  %v3118_v46 = vld [vmem:[%s4109_s3 + $0xb0] sm:$0xff]  }
 0xec0   : > { %1051 = vrot.lane.b32.xlu1 %v1049_v47, %s3325_s18  ;;  %v3119_v47 = vld [vmem:[%s4109_s3 + $0xb8] sm:$0xff]  }
 0xec1   : > { %v1057_v48 = vpop.permute.xlu0 %1056 }
 0xec4   : > { %1178 = vperm.xlu1 %3043, %v3506_v25  }
 0xf32   : > { %v1052_v49 = vpop.permute.xlu1 %1051 }
 0xf33   : > { %v3790_v4 = vsel %vm303_vm2, %v1052_v49, %v1043_v35   ;;  %v3112_v35 = vld [vmem:[%s4107_s1 + $0x160] sm:$0xff]  }
 0xf34   : > { %v1059_v50 = vsel %vm61_vm1, %v3790_v4, %v1057_v48  ;;  %v3330_v48 = vmov 5   ;;  %v2447_v49 = vld [vmem:[%s4108_s2 + $0x5] ss:$0 sm:$0xff] }
 0xf35   : > { %v1060_v51 = vpack.c.bf16 %v1059_v50, %v1059_v50  ;;  %3044 = vset.pattern.permute.xlu1 %v3330_v48 }
 0xf37   : > { %2832 = vmatmul.mubr.bf16.vlgmr.msra.gmra.mrb[16].mxu0 %v1060_v51 }
 0xf38   : > { %2875 = vmatprep.mubr.msk.bf16.mxu0 %vm3323_vm0, %v3321_v8  ;;  %2868 = vmatpush3.bf16.msra.mxu0 %v3116_v38 }
 0xf39   : > { %2869 = vmatprep.subr.bf16.mxu0 %v3321_v8 }
 0xf3c   : > { %2870 = vmatpush3.bf16.msra.mxu0 %v3117_v39  ;;  %v3130_v39 = vld [vmem:[%s4109_s3 + $0xd0] sm:$0xff]  }
 0xf3d   : > { %2871 = vmatprep.subr.bf16.mxu0 %v3321_v8 }
 0xf40   : > { %2872 = vmatpush3.bf16.msra.mxu0 %v3118_v46 }
 0xf41   : > { %2873 = vmatprep.subr.bf16.mxu0 %v3321_v8 }
 0xf43   : > { %v1179_v9 = vpop.permute.xlu1 %1178 }
 0xf44   : > { %v1187_v10 = vmul.f32 %v2412_v63, %v1179_v9  ;;  %2874 = vmatpush3.bf16.msra.mxu0 %v3119_v47 }
 0xf45   : > { %2879 = vmatprep.subr.bf16.mxu0 %v3321_v8 }
 0xf46   : > { %v1196_v12 = vadd.f32 %v2414_v11, %v1187_v10 }
0x100a   : > { %v1168_v56 = vpop.f32.mrb[16].mxu0 }
0x100b   : > { %v1169_v57 = vadd.f32 %v2402_v55, %v1168_v56  ;;  %v2833_v58 = vpop.f32.mrb[17].mxu0 }
0x100c   : > { %v1171_v59 = vpop.f32.mrb[18].mxu0 }
0x100d   : > { %v1174_v60 = vmax.f32 %v1169_v57, 0.0  ;;  %v2834_v61 = vpop.f32.mrb[19].mxu0  ;;  %v2459_v59 = vld [vmem:[%s4111_s5 + $0x5] ss:$0 sm:$0xff] }
0x100f   : > { %v1197_v62 = vpack.c.bf16 %v1174_v60, %v1174_v60 }
0x1011   : > { %2844 = vmatmul.mubr.msk.bf16.vlgmr.msra.gmra.mrb[16].mxu1 %vm61_vm1, %v1197_v62 }
0x1012   : > { %2863 = vmatprep.mubr.msk.bf16.mxu1 %vm3323_vm0, %v3321_v8  ;;  %2848 = vmatpush3.bf16.msra.mxu1 %v3108_v30  ;;  %v3126_v30 = vld [vmem:[%s4107_s1 + $0x1b0] sm:$0xff]  }
0x1013   : > { %2849 = vmatprep.subr.bf16.mxu1 %v3321_v8 }
0x1016   : > { %2850 = vmatpush3.bf16.msra.mxu1 %v3109_v31  ;;  %v3128_v31 = vld [vmem:[%s4109_s3 + $0xc0] sm:$0xff]  }
0x1017   : > { %2851 = vmatprep.subr.bf16.mxu1 %v3321_v8 }
0x101a   : > { %2852 = vmatpush3.bf16.msra.mxu1 %v3110_v32  ;;  %v3129_v32 = vld [vmem:[%s4109_s3 + $0xc8] sm:$0xff]  }
0x101b   : > { %2853 = vmatprep.subr.bf16.mxu1 %v3321_v8 }
0x101e   : > { %2854 = vmatpush3.bf16.msra.mxu1 %v3111_v34 }
0x101f   : > { %2855 = vmatprep.subr.bf16.mxu1 %v3321_v8 }
0x1022   : > { %2856 = vmatpush3.bf16.msra.mxu1 %v3112_v35 }
0x1023   : > { %2857 = vmatprep.subr.bf16.mxu1 %v3321_v8 }
0x1026   : > { %2858 = vmatpush3.bf16.msra.mxu1 %v3113_v36 }
0x1027   : > { %2859 = vmatprep.subr.bf16.mxu1 %v3321_v8 }
0x102a   : > { %2860 = vmatpush3.bf16.msra.mxu1 %v3114_v37 }
0x102b   : > { %2861 = vmatprep.subr.bf16.mxu1 %v3321_v8 }
0x10e4   : > { %v1268_v13 = vpop.f32.mrb[16].mxu1 }
0x10e5   : > { %v1274_v14 = vadd.f32 %v1268_v13, %v1196_v12  ;;  %v2845_v15 = vpop.f32.mrb[17].mxu1 }
0x10e6   : > { %v1271_v16 = vpop.f32.mrb[18].mxu1 }
0x10e7   : > { %v2428_v17 = vmul.f32 -1.442695, %v1274_v14  ;;  %v2846_v18 = vpop.f32.mrb[19].mxu1 }
0x10e9   : > { %3168 = vpow2.f32 %v2428_v17 }
0x10f3   : > { %v3169_v19 = vpop.eup %3168 }
0x10f4   : > { %v1278_v20 = vadd.f32 1.0, %v3169_v19 }
0x10f6   : > { %3170 = vrcp.f32 %v1278_v20 }
0x1100   : > { %v3171_v21 = vpop.eup %3170 }
0x1101   : > { %v1281_v22 = vmul.f32 2.0, %v3171_v21  ;;  %v1283_v27 = vmul.f32 %v3171_v21, %v1174_v60 }
0x1103   : > { %v2429_v23 = vadd.f32 -1.0, %v1281_v22  ;;  %v3120_v22 = vld [vmem:[%s4107_s1 + $0x180] sm:$0xff]  }
0x1105   : > { %1285 = vrot.lane.b32.xlu0 %v2429_v23, %s3322_s20  ;;  %v3121_v23 = vld [vmem:[%s4107_s1 + $0x188] sm:$0xff]  }
0x1177   : > { %v1286_v24 = vpop.permute.xlu0 %1285 }
0x1178   : > { %v1288_v26 = vmul.f32 %v3171_v21, %v1286_v24  ;;  %v3122_v24 = vld [vmem:[%s4107_s1 + $0x190] sm:$0xff]  }
0x117a   : > { %1290 = vrot.lane.b32.xlu1 %v1288_v26, %s3325_s18 }
0x11ec   : > { %v1291_v28 = vpop.permute.xlu1 %1290 }
0x11ed   : > { %v1293_v29 = vadd.f32 %v1291_v28, %v1283_v27  ;;  %v3123_v27 = vld [vmem:[%s4107_s1 + $0x198] sm:$0xff]   ;;  %v3124_v28 = vld [vmem:[%s4107_s1 + $0x1a0] sm:$0xff]  }
0x11ef   : > { %3172 = vtanh.f32 %v1293_v29 }
0x11f9   : > { %v3173_v33 = vpop.eup %3172 }
0x11fa   : > { %1296 = vrot.lane.b32.xlu0 %v3173_v33, %s3322_s20 }
0x11fe   : > { %1306 = vrot.lane.b32.xlu0 %v3295_v2, %s3322_s20  ;;  %v3115_v2 = vld [vmem:[%s4107_s1 + $0x178] sm:$0xff]  }
0x11ff   : > { %2862 = vmatpush3.bf16.msra.mxu1 %v3115_v2 }
0x1200   : > { %2899 = vmatprep.subr.bf16.mxu1 %v3321_v8 }
0x126c   : > { %v1297_v40 = vpop.permute.xlu0 %1296 }
0x126d   : > { %v1299_v41 = vmul.f32 %v3171_v21, %v1297_v40  ;;  %v3131_v40 = vld [vmem:[%s4109_s3 + $0xd8] sm:$0xff]  }
0x126f   : > { %1301 = vrot.lane.b32.xlu1 %v1299_v41, %s3325_s18  ;;  %v3331_v41 = vmov 6  }
0x1270   : > { %v1307_v42 = vpop.permute.xlu0 %1306 }
0x1273   : > { %1428 = vperm.xlu1 %3044, %v3506_v25   ;;  %v2457_v25 = vld [vmem:[%s4110_s4 + $0x5] ss:$0 sm:$0xff] }
0x1277   : > { %3045 = vset.pattern.permute.xlu1 %v3331_v41 }
0x12e1   : > { %v1302_v43 = vpop.permute.xlu1 %1301 }
0x12e2   : > { %v3864_v3 = vsel %vm303_vm2, %v1302_v43, %v1293_v29   ;;  %v3125_v29 = vld [vmem:[%s4107_s1 + $0x1a8] sm:$0xff]   ;;  %v2492_v43 = vld [vmem:[%s4108_s2 + $0x6] ss:$0 sm:$0xff] }
0x12e3   : > { %v1309_v44 = vsel %vm61_vm1, %v3864_v3, %v1307_v42  ;;  %v3953_v42 = vld [vmem:[%s3503_s29] sm:$0x3] }
0x12e4   : > { %v1310_v45 = vpack.c.bf16 %v1309_v44, %v1309_v44 }
0x12e6   : > { %2864 = vmatmul.mubr.bf16.vlgmr.msra.gmra.mrb[20].mxu1 %v1310_v45 }
0x12e7   : > { %2907 = vmatprep.mubr.msk.bf16.mxu1 %vm3323_vm0, %v3321_v8  ;;  %2900 = vmatpush3.bf16.msra.mxu1 %v3128_v31 }
0x12e8   : > { %2901 = vmatprep.subr.bf16.mxu1 %v3321_v8 }
0x12eb   : > { %2902 = vmatpush3.bf16.msra.mxu1 %v3129_v32 }
0x12ec   : > { %2903 = vmatprep.subr.bf16.mxu1 %v3321_v8 }
0x12ef   : > { %2904 = vmatpush3.bf16.msra.mxu1 %v3130_v39 }
0x12f0   : > { %2905 = vmatprep.subr.bf16.mxu1 %v3321_v8 }
0x12f2   : > { %v1429_v57 = vpop.permute.xlu1 %1428 }
0x12f3   : > { %v1437_v58 = vmul.f32 %v2457_v25, %v1429_v57  ;;  %2906 = vmatpush3.bf16.msra.mxu1 %v3131_v40 }
0x12f4   : > { %2911 = vmatprep.subr.bf16.mxu1 %v3321_v8 }
0x12f5   : > { %v1446_v60 = vadd.f32 %v2459_v59, %v1437_v58 }
0x13b9   : > { %v1418_v50 = vpop.f32.mrb[20].mxu1 }
0x13ba   : > { %v1419_v51 = vadd.f32 %v2447_v49, %v1418_v50  ;;  %v2865_v52 = vpop.f32.mrb[21].mxu1 }
0x13bb   : > { %v1421_v53 = vpop.f32.mrb[22].mxu1 }
0x13bc   : > { %v1424_v54 = vmax.f32 %v1419_v51, 0.0  ;;  %v2866_v55 = vpop.f32.mrb[23].mxu1  ;;  %v2502_v51 = vld [vmem:[%s4110_s4 + $0x6] ss:$0 sm:$0xff] }
0x13be   : > { %v1447_v56 = vpack.c.bf16 %v1424_v54, %v1424_v54 }
0x13c0   : > { %2876 = vmatmul.mubr.msk.bf16.vlgmr.msra.gmra.mrb[20].mxu0 %vm61_vm1, %v1447_v56 }
0x13c1   : > { %2895 = vmatprep.mubr.msk.bf16.mxu0 %vm3323_vm0, %v3321_v8  ;;  %2880 = vmatpush3.bf16.msra.mxu0 %v3120_v22  ;;  %v3137_v22 = vld [vmem:[%s4107_s1 + $0x1e8] sm:$0xff]  }
0x13c2   : > { %2881 = vmatprep.subr.bf16.mxu0 %v3321_v8 }
0x13c5   : > { %2882 = vmatpush3.bf16.msra.mxu0 %v3121_v23  ;;  %v3138_v23 = vld [vmem:[%s4107_s1 + $0x1f0] sm:$0xff]  }
0x13c6   : > { %2883 = vmatprep.subr.bf16.mxu0 %v3321_v8 }
0x13c9   : > { %2884 = vmatpush3.bf16.msra.mxu0 %v3122_v24  ;;  %v3140_v24 = vld [vmem:[%s4109_s3 + $0xe0] sm:$0xff]  }
0x13ca   : > { %2885 = vmatprep.subr.bf16.mxu0 %v3321_v8 }
0x13cd   : > { %2886 = vmatpush3.bf16.msra.mxu0 %v3123_v27 }
0x13ce   : > { %2887 = vmatprep.subr.bf16.mxu0 %v3321_v8 }
0x13d1   : > { %2888 = vmatpush3.bf16.msra.mxu0 %v3124_v28 }
0x13d2   : > { %2889 = vmatprep.subr.bf16.mxu0 %v3321_v8 }
0x13d5   : > { %2890 = vmatpush3.bf16.msra.mxu0 %v3125_v29 }
0x13d6   : > { %2891 = vmatprep.subr.bf16.mxu0 %v3321_v8 }
0x13d9   : > { %2892 = vmatpush3.bf16.msra.mxu0 %v3126_v30 }
0x13da   : > { %2893 = vmatprep.subr.bf16.mxu0 %v3321_v8 }
0x1493   : > { %v1518_v61 = vpop.f32.mrb[20].mxu0 }
0x1494   : > { %v1524_v62 = vadd.f32 %v1518_v61, %v1446_v60  ;;  %v2877_v63 = vpop.f32.mrb[21].mxu0 }
0x1495   : > { %v1521_v9 = vpop.f32.mrb[22].mxu0 }
0x1496   : > { %v2473_v10 = vmul.f32 -1.442695, %v1524_v62  ;;  %v2878_v11 = vpop.f32.mrb[23].mxu0 }
0x1498   : > { %3174 = vpow2.f32 %v2473_v10 }
0x14a2   : > { %v3175_v12 = vpop.eup %3174 }
0x14a3   : > { %v1528_v13 = vadd.f32 1.0, %v3175_v12 }
0x14a5   : > { %3176 = vrcp.f32 %v1528_v13 }
0x14af   : > { %v3177_v14 = vpop.eup %3176 }
0x14b0   : > { %v1531_v15 = vmul.f32 2.0, %v3177_v14  ;;  %v1533_v19 = vmul.f32 %v3177_v14, %v1424_v54  ;;  %v2504_v54 = vld [vmem:[%s4111_s5 + $0x6] ss:$0 sm:$0xff] }
0x14b2   : > { %v2474_v16 = vadd.f32 -1.0, %v1531_v15 }
0x14b4   : > { %1535 = vrot.lane.b32.xlu0 %v2474_v16, %s3322_s20  ;;  %v3132_v16 = vld [vmem:[%s4107_s1 + $0x1c0] sm:$0xff]  }
0x1526   : > { %v1536_v17 = vpop.permute.xlu0 %1535 }
0x1527   : > { %v1538_v18 = vmul.f32 %v3177_v14, %v1536_v17  ;;  %v3133_v17 = vld [vmem:[%s4107_s1 + $0x1c8] sm:$0xff]  }
0x1529   : > { %1540 = vrot.lane.b32.xlu1 %v1538_v18, %s3325_s18  ;;  %v3134_v18 = vld [vmem:[%s4107_s1 + $0x1d0] sm:$0xff]  }
0x159b   : > { %v1541_v20 = vpop.permute.xlu1 %1540 }
0x159c   : > { %v1543_v21 = vadd.f32 %v1541_v20, %v1533_v19  ;;  %v3135_v20 = vld [vmem:[%s4107_s1 + $0x1d8] sm:$0xff]  }
0x159e   : > { %3178 = vtanh.f32 %v1543_v21 }
0x15a8   : > { %v3179_v26 = vpop.eup %3178 }
0x15a9   : > { %1546 = vrot.lane.b32.xlu0 %v3179_v26, %s3322_s20  ;;  %v3141_v26 = vld [vmem:[%s4109_s3 + $0xe8] sm:$0xff]  }
0x15ad   : > { %1556 = vrot.lane.b32.xlu0 %v3291_v1, %s3322_s20  ;;  %v3127_v1 = vld [vmem:[%s4107_s1 + $0x1b8] sm:$0xff]  }
0x15ae   : > { %2894 = vmatpush3.bf16.msra.mxu0 %v3127_v1 }
0x15af   : > { %2931 = vmatprep.subr.bf16.mxu0 %v3321_v8 }
0x161b   : > { %v1547_v33 = vpop.permute.xlu0 %1546 }
0x161c   : > { %v1549_v34 = vmul.f32 %v3177_v14, %v1547_v33  ;;  %v3142_v33 = vld [vmem:[%s4109_s3 + $0xf0] sm:$0xff]  }
0x161e   : > { %1551 = vrot.lane.b32.xlu1 %v1549_v34, %s3325_s18  ;;  %v3143_v34 = vld [vmem:[%s4109_s3 + $0xf8] sm:$0xff]  }
0x161f   : > { %v1557_v35 = vpop.permute.xlu0 %1556 }
0x1622   : > { %1678 = vperm.xlu1 %3045, %v3953_v42  }
0x1690   : > { %v1552_v36 = vpop.permute.xlu1 %1551 }
0x1691   : > { %v3938_v2 = vsel %vm303_vm2, %v1552_v36, %v1543_v21   ;;  %v3136_v21 = vld [vmem:[%s4107_s1 + $0x1e0] sm:$0xff]  }
0x1692   : > { %v1559_v37 = vsel %vm61_vm1, %v3938_v2, %v1557_v35  ;;  %v3332_v35 = vmov 7   ;;  %v2537_v36 = vld [vmem:[%s4108_s2 + $0x7] ss:$0 sm:$0xff] }
0x1693   : > { %v1560_v38 = vpack.c.bf16 %v1559_v37, %v1559_v37  ;;  %3046 = vset.pattern.permute.xlu1 %v3332_v35  ;;  %3047 = vset.pattern.permute.xlu0 %v3332_v35 }
0x1695   : > { %2896 = vmatmul.mubr.bf16.vlgmr.msra.gmra.mrb[24].mxu0 %v1560_v38 }
0x1696   : > { %2939 = vmatprep.mubr.msk.bf16.mxu0 %vm3323_vm0, %v3321_v8  ;;  %2932 = vmatpush3.bf16.msra.mxu0 %v3140_v24 }
0x1697   : > { %2933 = vmatprep.subr.bf16.mxu0 %v3321_v8 }
0x169a   : > { %2934 = vmatpush3.bf16.msra.mxu0 %v3141_v26 }
0x169b   : > { %2935 = vmatprep.subr.bf16.mxu0 %v3321_v8 }
0x169e   : > { %2936 = vmatpush3.bf16.msra.mxu0 %v3142_v33 }
0x169f   : > { %2937 = vmatprep.subr.bf16.mxu0 %v3321_v8 }
0x16a1   : > { %v1679_v52 = vpop.permute.xlu1 %1678 }
0x16a2   : > { %v1687_v53 = vmul.f32 %v2502_v51, %v1679_v52  ;;  %2938 = vmatpush3.bf16.msra.mxu0 %v3143_v34 }
0x16a4   : > { %v1696_v55 = vadd.f32 %v2504_v54, %v1687_v53 }
0x1768   : > { %v1668_v44 = vpop.f32.mrb[24].mxu0 }
0x1769   : > { %v1669_v45 = vadd.f32 %v2492_v43, %v1668_v44  ;;  %v2897_v46 = vpop.f32.mrb[25].mxu0  ;;  %v2547_v44 = vld [vmem:[%s4110_s4 + $0x7] ss:$0 sm:$0xff] }
0x176a   : > { %v1671_v47 = vpop.f32.mrb[26].mxu0 }
0x176b   : > { %v1674_v48 = vmax.f32 %v1669_v45, 0.0  ;;  %v2898_v49 = vpop.f32.mrb[27].mxu0 }
0x176d   : > { %v1697_v50 = vpack.c.bf16 %v1674_v48, %v1674_v48 }
0x176f   : > { %2908 = vmatmul.mubr.msk.bf16.vlgmr.msra.gmra.mrb[24].mxu1 %vm61_vm1, %v1697_v50 }
0x1770   : > { %2927 = vmatprep.mubr.msk.bf16.mxu1 %vm3323_vm0, %v3321_v8  ;;  %2912 = vmatpush3.bf16.msra.mxu1 %v3132_v16 }
0x1771   : > { %2913 = vmatprep.subr.bf16.mxu1 %v3321_v8 }
0x1774   : > { %2914 = vmatpush3.bf16.msra.mxu1 %v3133_v17 }
0x1775   : > { %2915 = vmatprep.subr.bf16.mxu1 %v3321_v8 }
0x1778   : > { %2916 = vmatpush3.bf16.msra.mxu1 %v3134_v18 }
0x1779   : > { %2917 = vmatprep.subr.bf16.mxu1 %v3321_v8 }
0x177c   : > { %2918 = vmatpush3.bf16.msra.mxu1 %v3135_v20 }
0x177d   : > { %2919 = vmatprep.subr.bf16.mxu1 %v3321_v8 }
0x1780   : > { %2920 = vmatpush3.bf16.msra.mxu1 %v3136_v21 }
0x1781   : > { %2921 = vmatprep.subr.bf16.mxu1 %v3321_v8 }
0x1784   : > { %2922 = vmatpush3.bf16.msra.mxu1 %v3137_v22 }
0x1785   : > { %2923 = vmatprep.subr.bf16.mxu1 %v3321_v8 }
0x1788   : > { %2924 = vmatpush3.bf16.msra.mxu1 %v3138_v23 }
0x1789   : > { %2925 = vmatprep.subr.bf16.mxu1 %v3321_v8 }
0x1842   : > { %v1768_v56 = vpop.f32.mrb[24].mxu1 }
0x1843   : > { %v1774_v25 = vadd.f32 %v1768_v56, %v1696_v55  ;;  %v2909_v57 = vpop.f32.mrb[25].mxu1 }
0x1844   : > { %v1771_v58 = vpop.f32.mrb[26].mxu1 }
0x1845   : > { %v2518_v59 = vmul.f32 -1.442695, %v1774_v25  ;;  %v2910_v60 = vpop.f32.mrb[27].mxu1 }
0x1847   : > { %3180 = vpow2.f32 %v2518_v59 }
0x1851   : > { %v3181_v61 = vpop.eup %3180 }
0x1852   : > { %v1778_v62 = vadd.f32 1.0, %v3181_v61 }
0x1854   : > { %3182 = vrcp.f32 %v1778_v62 }
0x185e   : > { %v3183_v63 = vpop.eup %3182 }
0x185f   : > { %v1781_v9 = vmul.f32 2.0, %v3183_v63  ;;  %v1783_v13 = vmul.f32 %v3183_v63, %v1674_v48 }
0x1861   : > { %v2519_v10 = vadd.f32 -1.0, %v1781_v9 }
0x1863   : > { %1785 = vrot.lane.b32.xlu0 %v2519_v10, %s3322_s20 }
0x18d5   : > { %v1786_v11 = vpop.permute.xlu0 %1785 }
0x18d6   : > { %v1788_v12 = vmul.f32 %v3183_v63, %v1786_v11 }
0x18d8   : > { %1790 = vrot.lane.b32.xlu1 %v1788_v12, %s3325_s18 }
0x194a   : > { %v1791_v14 = vpop.permute.xlu1 %1790 }
0x194b   : > { %v1793_v15 = vadd.f32 %v1791_v14, %v1783_v13  ;;  %v3193_v13 = vld [vmem:[%s4112_s6] sm:$0xff] (%p42_p0)   ;;  %v3333_v14 = vmov (%p42_p0), 0.0  }
0x194c   :  { %2943 = vmatprep.subr.bf16.mxu0 (%p42_p0), %v3333_v14 }
0x194d   : > { %3184 = vtanh.f32 %v1793_v15 }
0x1957   : > { %v3185_v19 = vpop.eup %3184 }
0x1958   : > { %1796 = vrot.lane.b32.xlu0 %v3185_v19, %s3322_s20 }
0x195c   : > { %1806 = vrot.lane.b32.xlu0 %v3287_v0, %s3322_s20  ;;  %v3139_v0 = vld [vmem:[%s4107_s1 + $0x1f8] sm:$0xff]   ;;  %s3201_s1 = scalar_lea.vmem (%p42_p0), %s2189_s0, 32 }
0x195d   : > { %2926 = vmatpush3.bf16.msra.mxu1 %v3139_v0  ;;  %p3202_p1 = scmp.ne.s32.totalorder (%p42_p0), %s2189_s0, %s3201_s1  ;;  %p3207_p3 = scmp.lt.s32.totalorder (%p42_p0), %s3201_s1, %s3201_s1 }
0x195f   :  { %p3208_p4 = por (%p42_p0), %p3207_p3, %p3206_p2 }
0x1961   :  { %p3209_p5 = pnand (%p42_p0), %p3208_p4, %p3202_p1 }
0x19ca   : > { %v1797_v27 = vpop.permute.xlu0 %1796 }
0x19cb   : > { %v1799_v28 = vmul.f32 %v3183_v63, %v1797_v27 }
0x19cd   : > { %1801 = vrot.lane.b32.xlu1 %v1799_v28, %s3325_s18 }
0x19ce   : > { %v1807_v29 = vpop.permute.xlu0 %1806 }
0x19d1   : > { %1928 = vperm.xlu1 %3046, %v3953_v42   ;;  %v2549_v42 = vld [vmem:[%s4111_s5 + $0x7] ss:$0 sm:$0xff] }
0x1a3f   : > { %v1802_v30 = vpop.permute.xlu1 %1801 }
0x1a40   : > { %v1804_v1 = vsel %vm303_vm2, %v1802_v30, %v1793_v15   ;;  %v3194_v15 = vld [vmem:[%s4112_s6 + $0x8] sm:$0xff] (%p42_p0)  }
0x1a41   : > { %v1809_v31 = vsel %vm61_vm1, %v1804_v1, %v1807_v29 }
0x1a42   : > { %v1810_v32 = vpack.c.bf16 %v1809_v31, %v1809_v31 }
0x1a44   : > { %2928 = vmatmul.mubr.bf16.vlgmr.msra.gmra.mrb[28].mxu1 %v1810_v32 }
0x1a50   : > { %v1929_v45 = vpop.permute.xlu1 %1928 }
0x1a51   : > { %v1937_v46 = vmul.f32 %v2547_v44, %v1929_v45 }
0x1a53   : > { %v1946_v47 = vadd.f32 %v2549_v42, %v1937_v46 }
0x1b17   : > { %v1918_v37 = vpop.f32.mrb[28].mxu1 }
0x1b18   : > { %v1919_v38 = vadd.f32 %v2537_v36, %v1918_v37  ;;  %v2929_v39 = vpop.f32.mrb[29].mxu1 }
0x1b19   : > { %v1921_v40 = vpop.f32.mrb[30].mxu1 }
0x1b1a   : > { %v1924_v41 = vmax.f32 %v1919_v38, 0.0  ;;  %v2930_v8 = vpop.f32.mrb[31].mxu1 }
0x1b1c   : > { %v1947_v43 = vpack.c.bf16 %v1924_v41, %v1924_v41 }
0x1b1e   : > { %2940 = vmatmul.mubr.msk.bf16.vlgmr.msra.gmra.mrb[28].mxu0 %vm61_vm1, %v1947_v43 }
0x1b1f   :  { %2944 = vmatpush3.bf16.msra.mxu0 (%p42_p0), %v3193_v13  ;;  %2947 = vmatprep.mubr.msk.bf16.mxu0 (%p42_p0), %vm3334_vm3, %v3333_v14 }
0x1b20   :  { %2945 = vmatprep.subr.bf16.mxu0 (%p42_p0), %v3333_v14 }
0x1b23   :  { %2946 = vmatpush3.bf16.msra.mxu0 (%p42_p0), %v3194_v15 }
0x1bf1   : > { %v2018_v48 = vpop.f32.mrb[28].mxu0 }
0x1bf2   : > { %v2024_v49 = vadd.f32 %v2018_v48, %v1946_v47  ;;  %v2941_v50 = vpop.f32.mrb[29].mxu0 }
0x1bf3   : > { %v2021_v51 = vpop.f32.mrb[30].mxu0 }
0x1bf4   : > { %v2563_v52 = vmul.f32 -1.442695, %v2024_v49  ;;  %v2942_v53 = vpop.f32.mrb[31].mxu0 }
0x1bf6   : > { %3186 = vpow2.f32 %v2563_v52 }
0x1c00   : > { %v3187_v54 = vpop.eup %3186 }
0x1c01   : > { %v2028_v55 = vadd.f32 1.0, %v3187_v54 }
0x1c03   : > { %3188 = vrcp.f32 %v2028_v55 }
0x1c0d   : > { %v3189_v56 = vpop.eup %3188 }
0x1c0e   : > { %v2031_v25 = vmul.f32 2.0, %v3189_v56  ;;  %v2033_v60 = vmul.f32 %v3189_v56, %v1924_v41 }
0x1c10   : > { %v2564_v57 = vadd.f32 -1.0, %v2031_v25 }
0x1c12   : > { %2035 = vrot.lane.b32.xlu0 %v2564_v57, %s3322_s20 }
0x1c84   : > { %v2036_v58 = vpop.permute.xlu0 %2035 }
0x1c85   : > { %v2038_v59 = vmul.f32 %v3189_v56, %v2036_v58 }
0x1c87   : > { %2040 = vrot.lane.b32.xlu1 %v2038_v59, %s3325_s18 }
0x1cf9   : > { %v2041_v61 = vpop.permute.xlu1 %2040 }
0x1cfa   : > { %v2043_v62 = vadd.f32 %v2041_v61, %v2033_v60 }
0x1cfc   : > { %3190 = vtanh.f32 %v2043_v62 }
0x1d06   : > { %v3191_v63 = vpop.eup %3190 }
0x1d07   : > { %2046 = vrot.lane.b32.xlu0 %v3191_v63, %s3322_s20 }
0x1d79   : > { %v2047_v9 = vpop.permute.xlu0 %2046 }
0x1d7a   : > { %v2049_v10 = vmul.f32 %v3189_v56, %v2047_v9 }
0x1d7c   : > { %2051 = vrot.lane.b32.xlu1 %v2049_v10, %s3325_s18 }
0x1dea   :  { %44 = sbr.rel (!%p42_p0) target bundleno = 3 (0x3), region = 111 }
0x1dee   : > { %v2052_v11 = vpop.permute.xlu1 %2051 }
0x1def   : > { %v2054_v12 = vsel %vm303_vm2, %v2052_v11, %v2043_v62  }
0x1df0   : > { %v4118_v0 = vmov %v2054_v12  ;;  %v2055_v16 = vpack.c.bf16 (%p42_p0), %v2054_v12, %v2054_v12  ;;  %2171 = vst.msk [vmem:[#allocation4] sm:$0x3] (%p42_p0), %vm2170_vm4, %v2054_v12 }
0x1df2   :  { %2948 = vmatmul.mubr.msk.bf16.vlgmr.msra.gmra.mrb[0].mxu0 %vm303_vm2, %v2055_v16 }
0x1df3   :  { %3212 = shalt.err (!%p3209_p5)
}
0x1df4   :  { %s3213_s4 = scalar_lea.hbm %s4117_s11, 32 }
0x1df5   :  { %p3214_p6 = scmp.ne.s32.totalorder %s4117_s11, %s3213_s4  ;;  %p3217_p7 = scmp.lt.u32.totalorder %s3213_s4, %s4117_s11 }
0x1df7   :  { %p3219_p8 = pnand %p3217_p7, %p3214_p6 }
0x1df9   :  { %3222 = shalt.err (!%p3219_p8)
}
0x1dfa   :  { %2191 = dma.vmem_to_hbm [thread:$0]  %s2189_s0, 32, %s4117_s11, [#allocation5]   ;;  %v2565_v6 = vld [vmem:[%s4113_s7] ss:$0 sm:$0xff]  ;;  %vm2124_vm5 = vcmask 25600  }
0x1dfb   :  { %v2569_v36 = vld [vmem:[%s4114_s8] ss:$0 sm:$0xff]  ;;  %s3336_s27 = smov [#allocation2]  }
0x1dfc   :  { %v2570_v39 = vld [vmem:[%s4115_s9] ss:$0 sm:$0xff]  ;;  %s2178_s28 = sshll.u32 %s3336_s27, 4  ;;  %s2179_s28 = int_to_ptr.vmem [resolvable:$true] %s2178_s28 }
0x1dfd   :  { %s3223_s8 = scalar_lea.vmem %s2179_s28, 32  ;;  %p3228_p10 = scmp.lt.s32.totalorder %s2179_s28, %s2179_s28 }
0x1dfe   :  { %p3224_p9 = scmp.ne.s32.totalorder %s2179_s28, %s3223_s8  ;;  %p3229_p11 = scmp.lt.s32.totalorder %s3223_s8, %s3223_s8 }
0x1e00   :  { %p3230_p12 = por %p3229_p11, %p3228_p10 }
0x1e02   :  { %p3231_p13 = pnand %p3230_p12, %p3224_p9 }
0x1ec5   :  { %v2117_v7 = vpop.f32.mrb[0].mxu0 }
0x1ec6   :  { %v2118_v5 = vadd.f32 %v2565_v6, %v2117_v7  ;;  %v2949_v4 = vpop.f32.mrb[1].mxu0 }
0x1ec7   :  { %v2120_v3 = vpop.f32.mrb[2].mxu0 }
0x1ec8   :  { %v2123_v2 = vmax.f32 %v2118_v5, 0.0  ;;  %v2950_v1 = vpop.f32.mrb[3].mxu0 }
0x1eca   :  { %v2125_v17 = vsel %vm2124_vm5, %v2123_v2, 0.0 }
0x1ecb   :  { %v2126_v18 = vrot.slane %v2125_v17, 4 }
0x1ecd   :  { %v2127_v19 = vadd.f32 %v2126_v18, %v2125_v17 }
0x1ecf   :  { %v2128_v20 = vrot.slane %v2127_v19, 2 }
0x1ed1   :  { %v2129_v21 = vadd.f32 %v2128_v20, %v2127_v19 }
0x1ed3   :  { %v2130_v22 = vrot.slane %v2129_v21, 1 }
0x1ed5   :  { %v2131_v23 = vadd.f32 %v2130_v22, %v2129_v21 }
0x1ed7   :  { %v2133_v0 = vmul.f32 0.5, %v2131_v23 }
0x1ed9   :  { %v2134_v24 = vsub.f32 %v2123_v2, %v2133_v0 }
0x1edb   :  { %v2135_v26 = vmul.f32 %v2134_v24, %v2134_v24  ;;  %v2151_v37 = vmul.f32 %v2569_v36, %v2134_v24 }
0x1edd   :  { %v2136_v27 = vsel %vm2124_vm5, %v2135_v26, 0.0 }
0x1ede   :  { %v2137_v28 = vrot.slane %v2136_v27, 4 }
0x1ee0   :  { %v2138_v29 = vadd.f32 %v2137_v28, %v2136_v27 }
0x1ee2   :  { %v2139_v30 = vrot.slane %v2138_v29, 2 }
0x1ee4   :  { %v2140_v31 = vadd.f32 %v2139_v30, %v2138_v29 }
0x1ee6   :  { %v2141_v32 = vrot.slane %v2140_v31, 1 }
0x1ee8   :  { %v2142_v33 = vadd.f32 %v2141_v32, %v2140_v31 }
0x1eea   :  { %v2143_v34 = vmul.f32 0.5, %v2142_v33 }
0x1eec   :  { %v2152_v35 = vadd.f32 1e-05, %v2143_v34 }
0x1eee   :  { %3195 = vrsqrt.f32 %v2152_v35 }
0x1ef8   :  { %v3196_v38 = vpop.eup %3195 }
0x1ef9   :  { %v2154_v40 = vmul.f32 %v3196_v38, %v2151_v37 }
0x1efb   :  { %v2162_v41 = vadd.f32 %v2570_v39, %v2154_v40 }
0x1efd   :  { %v2571_v8 = vmul.f32 -1.442695, %v2162_v41 }
0x1eff   :  { %3197 = vpow2.f32 %v2571_v8 }
0x1f09   :  { %v3198_v43 = vpop.eup %3197 }
0x1f0a   :  { %v2166_v44 = vadd.f32 1.0, %v3198_v43 }
0x1f0c   :  { %3199 = vrcp.f32 %v2166_v44 }
0x1f16   :  { %v3200_v45 = vpop.eup %3199 }
0x1f17   :  { %2169 = vst.msk [vmem:[#allocation2] sm:$0x3] %vm2124_vm5, %v3200_v45 }
0x1f18   :  { %3234 = shalt.err (!%p3231_p13)
}
0x1f19   :  { %s3235_s12 = scalar_lea.hbm %s4116_s10, 32 }
0x1f1a   :  { %p3236_p0 = scmp.ne.s32.totalorder %s4116_s10, %s3235_s12  ;;  %p3239_p1 = scmp.lt.u32.totalorder %s3235_s12, %s4116_s10 }
0x1f1c   :  { %p3241_p2 = pnand %p3239_p1, %p3236_p0 }
0x1f1e   :  { %3244 = shalt.err (!%p3241_p2)
}
0x1f1f   :  { %2181 = dma.vmem_to_hbm [thread:$0]  %s2179_s28, 32, %s4116_s10, [#allocation3]  }
0x1f20   :  { %3281 = dma.done.wait [#allocation3], 32  }
0x1f21   :  { %3282 = vsyncadd [#allocation3], 4294967264 }
0x1f22   :  { %3283 = dma.done.wait [#allocation5], 32  }
0x1f23   :  { %3284 = vsyncadd [#allocation5], 4294967264 }
0x1f24   :  { %2198 = vsyncpa [#allocation3], 1 }
0x1f25   :  { %2199 = vsyncpa [#allocation5], 1 }

</bundles_post_ra>
